<compile_context>
chip_gen: v7x
topology: tpu7x:2x2x1
jax: 0.10.0
libtpu: 0.0.40
codegen_flags: <defaults>
</compile_context>

<pallas_src>
import jax
import jax.numpy as jnp
from jax.experimental import pallas as pl
from jax.experimental.pallas import tpu as pltpu

INPUT_DIM = 5
HIDDEN_DIM = 10
OUTPUT_DIM = 1
GATE_PAD = 128  # lane slot per gate (vreg lane width)


def lstm_kernel(x_ref, w_ih_p_ref, w_hh_p_ref, b_p_ref, w_out_p_ref,
                b_out_ref, out_ref):
    """Single-layer LSTM forward + final linear layer.

    x_ref       : (T*B, D_in)    f32  (time-major; rows [t*B:(t+1)*B] = step t)
    w_ih_p_ref  : (D_in, 4*GP)   f32  (W_ih^T, gate g in lanes [g*GP, g*GP+H))
    w_hh_p_ref  : (GP, 4*GP)     f32  (W_hh^T, rows >= H are zero)
    b_p_ref     : (1, 4*GP)      f32  (b_ih + b_hh, gate-slotted, rest zero)
    w_out_p_ref : (GP, O)        f32  (Linear.weight^T, rows >= H are zero)
    b_out_ref   : (1, O)         f32
    out_ref     : (B, O)         f32
    """
    GP = GATE_PAD
    B = out_ref.shape[0]
    TB = x_ref.shape[0]
    T = TB // B

    w_hh_p = w_hh_p_ref[...]                                  # (GP, 4*GP)

    # Hoisted input projection for all T steps, bias folded in: one MXU matmul.
    gates_x = (jnp.dot(x_ref[...], w_ih_p_ref[...],
                       preferred_element_type=jnp.float32)
               + b_p_ref[...])                                # (T*B, 4*GP)

    h = jnp.zeros((B, GP), jnp.float32)
    c = jnp.zeros((B, GP), jnp.float32)

    # Recurrence: fully unrolled.  Only the h-dependent matmul is serial.
    for t in range(T):
        g = (gates_x[t * B:(t + 1) * B, :]                    # static slice
             + jnp.dot(h, w_hh_p, preferred_element_type=jnp.float32))
        # Lane-aligned whole-vreg gate slices (PyTorch gate order i, f, g, o).
        i_g = jax.nn.sigmoid(g[:, 0 * GP:1 * GP])
        f_g = jax.nn.sigmoid(g[:, 1 * GP:2 * GP])
        g_g = jnp.tanh(g[:, 2 * GP:3 * GP])
        o_g = jax.nn.sigmoid(g[:, 3 * GP:4 * GP])
        c = f_g * c + i_g * g_g
        h = o_g * jnp.tanh(c)

    # Final Linear on the last hidden state (padded rows of W_out are zero).
    out_ref[...] = (jnp.dot(h, w_out_p_ref[...],
                            preferred_element_type=jnp.float32)
                    + b_out_ref[...])


def _pad_gate_cols(w_t, h, gp):
    """(rows, 4*h) -> (rows, 4*gp): gate g occupies lanes [g*gp, g*gp + h)."""
    parts = [jnp.pad(w_t[:, g * h:(g + 1) * h], ((0, 0), (0, gp - h)))
             for g in range(4)]
    return jnp.concatenate(parts, axis=1)


def lstm_model_forward(x, w_ih, w_hh, b_ih, b_hh, w_lin, b_lin):
    """x: (T, B, D_in) float32 -> (B, OUTPUT_DIM) float32."""
    T, B, D = x.shape
    assert D == INPUT_DIM
    H, GP = HIDDEN_DIM, GATE_PAD

    # Free layout plumbing in the wrapper (no in-kernel transposes/reshapes).
    x2d = x.reshape(T * B, D)                                   # (T*B, D_in)
    w_ih_p = _pad_gate_cols(w_ih.T, H, GP)                      # (D_in, 4*GP)
    w_hh_p = jnp.pad(_pad_gate_cols(w_hh.T, H, GP),
                     ((0, GP - H), (0, 0)))                     # (GP, 4*GP)
    b_p = _pad_gate_cols((b_ih + b_hh).reshape(1, 4 * H), H, GP)  # (1, 4*GP)
    w_out_p = jnp.pad(w_lin.T, ((0, GP - H), (0, 0)))           # (GP, O)
    b_out = b_lin.reshape(1, OUTPUT_DIM)                        # (1, O)

    vmem = pl.BlockSpec(memory_space=pltpu.MemorySpace.VMEM)
    return pl.pallas_call(
        lstm_kernel,
        out_shape=jax.ShapeDtypeStruct((B, OUTPUT_DIM), jnp.float32),
        in_specs=[vmem] * 6,
        out_specs=vmem,
    )(x2d, w_ih_p, w_hh_p, b_p, w_out_p, b_out)


def _reference_forward(x, w_ih, w_hh, b_ih, b_hh, w_lin, b_lin):
    """Pure-JAX reference matching torch.nn.LSTM + Linear semantics."""
    T, B, _ = x.shape
    H = HIDDEN_DIM
    h = jnp.zeros((B, H), jnp.float32)
    c = jnp.zeros((B, H), jnp.float32)
    b = b_ih + b_hh
    for t in range(T):
        gates = x[t] @ w_ih.T + h @ w_hh.T + b
        i = jax.nn.sigmoid(gates[:, 0 * H:1 * H])
        f = jax.nn.sigmoid(gates[:, 1 * H:2 * H])
        g = jnp.tanh(gates[:, 2 * H:3 * H])
        o = jax.nn.sigmoid(gates[:, 3 * H:4 * H])
        c = f * c + i * g
        h = o * jnp.tanh(c)
    return h @ w_lin.T + b_lin


if __name__ == "__main__":
    key = jax.random.PRNGKey(0)
    T, B = 8, 2  # seq_len=8, batch=2

    ks = jax.random.split(key, 7)
    bound = 1.0 / jnp.sqrt(HIDDEN_DIM)

    x = jax.random.normal(ks[0], (T, B, INPUT_DIM), dtype=jnp.float32)
    w_ih = jax.random.uniform(ks[1], (4 * HIDDEN_DIM, INPUT_DIM),
                              minval=-bound, maxval=bound, dtype=jnp.float32)
    w_hh = jax.random.uniform(ks[2], (4 * HIDDEN_DIM, HIDDEN_DIM),
                              minval=-bound, maxval=bound, dtype=jnp.float32)
    b_ih = jax.random.uniform(ks[3], (4 * HIDDEN_DIM,),
                              minval=-bound, maxval=bound, dtype=jnp.float32)
    b_hh = jax.random.uniform(ks[4], (4 * HIDDEN_DIM,),
                              minval=-bound, maxval=bound, dtype=jnp.float32)
    w_lin = jax.random.uniform(ks[5], (OUTPUT_DIM, HIDDEN_DIM),
                               minval=-bound, maxval=bound, dtype=jnp.float32)
    b_lin = jax.random.uniform(ks[6], (OUTPUT_DIM,),
                               minval=-bound, maxval=bound, dtype=jnp.float32)

    out = lstm_model_forward(x, w_ih, w_hh, b_ih, b_hh, w_lin, b_lin)
    out = jax.block_until_ready(out)

    ref = _reference_forward(x, w_ih, w_hh, b_ih, b_hh, w_lin, b_lin)
    assert out.shape == (B, OUTPUT_DIM)
    assert jnp.allclose(out, ref, atol=1e-5, rtol=1e-5)

    print("KERNEL_OK")
</pallas_src>

<mosaic_0001>
module attributes {stable_mosaic.version = 11 : i64} {
  func.func @lstm_kernel(%arg0: memref<16x5xf32, #tpu.memory_space<vmem>>, %arg1: memref<5x512xf32, #tpu.memory_space<vmem>>, %arg2: memref<128x512xf32, #tpu.memory_space<vmem>>, %arg3: memref<1x512xf32, #tpu.memory_space<vmem>>, %arg4: memref<128x1xf32, #tpu.memory_space<vmem>>, %arg5: memref<1x1xf32, #tpu.memory_space<vmem>>, %arg6: memref<2x1xf32, #tpu.memory_space<vmem>>) attributes {dimension_semantics = [], scalar_prefetch = 0 : i64, scratch_operands = 0 : i64, tpu.core_type = #tpu.core_type<tc>} {
    %c0 = arith.constant 0 : index
    %c0_0 = arith.constant 0 : index
    %0 = vector.load %arg2[%c0, %c0_0] : memref<128x512xf32, #tpu.memory_space<vmem>>, vector<128x512xf32>
    %c0_1 = arith.constant 0 : index
    %c0_2 = arith.constant 0 : index
    %1 = vector.load %arg0[%c0_1, %c0_2] : memref<16x5xf32, #tpu.memory_space<vmem>>, vector<16x5xf32>
    %c0_3 = arith.constant 0 : index
    %c0_4 = arith.constant 0 : index
    %2 = vector.load %arg1[%c0_3, %c0_4] : memref<5x512xf32, #tpu.memory_space<vmem>>, vector<5x512xf32>
    %cst = arith.constant dense<0.000000e+00> : vector<16x512xf32>
    %3 = tpu.matmul %1, %2, %cst {dimension_numbers = #tpu.dot_dimension_numbers<[1], [0], [0], [1], [0, 0, 1, 1], [], []>} : vector<16x5xf32>, vector<5x512xf32>, vector<16x512xf32> -> vector<16x512xf32>
    %c0_5 = arith.constant 0 : index
    %c0_6 = arith.constant 0 : index
    %4 = vector.load %arg3[%c0_5, %c0_6] : memref<1x512xf32, #tpu.memory_space<vmem>>, vector<1x512xf32>
    %5 = vector.broadcast %4 : vector<1x512xf32> to vector<16x512xf32>
    %6 = arith.addf %3, %5 : vector<16x512xf32>
    %cst_7 = arith.constant 0.000000e+00 : f32
    %7 = vector.broadcast %cst_7 : f32 to vector<2x128xf32>
    %cst_8 = arith.constant 0.000000e+00 : f32
    %8 = vector.broadcast %cst_8 : f32 to vector<2x128xf32>
    %9 = vector.extract_strided_slice %6 {offsets = [0, 0], sizes = [2, 512], strides = [1, 1]} : vector<16x512xf32> to vector<2x512xf32>
    %cst_9 = arith.constant dense<0.000000e+00> : vector<2x512xf32>
    %10 = tpu.matmul %7, %0, %cst_9 {dimension_numbers = #tpu.dot_dimension_numbers<[1], [0], [0], [1], [0, 0, 1, 1], [], []>} : vector<2x128xf32>, vector<128x512xf32>, vector<2x512xf32> -> vector<2x512xf32>
    %11 = arith.addf %9, %10 : vector<2x512xf32>
    %12 = vector.extract_strided_slice %11 {offsets = [0, 0], sizes = [2, 128], strides = [1, 1]} : vector<2x512xf32> to vector<2x128xf32>
    %13 = arith.negf %12 : vector<2x128xf32>
    %14 = math.exp %13 : vector<2x128xf32>
    %cst_10 = arith.constant 1.000000e+00 : f32
    %15 = vector.broadcast %cst_10 : f32 to vector<2x128xf32>
    %16 = arith.addf %15, %14 : vector<2x128xf32>
    %17 = arith.divf %15, %16 : vector<2x128xf32>
    %18 = vector.extract_strided_slice %11 {offsets = [0, 128], sizes = [2, 128], strides = [1, 1]} : vector<2x512xf32> to vector<2x128xf32>
    %19 = arith.negf %18 : vector<2x128xf32>
    %20 = math.exp %19 : vector<2x128xf32>
    %cst_11 = arith.constant 1.000000e+00 : f32
    %21 = vector.broadcast %cst_11 : f32 to vector<2x128xf32>
    %22 = arith.addf %21, %20 : vector<2x128xf32>
    %23 = arith.divf %21, %22 : vector<2x128xf32>
    %24 = vector.extract_strided_slice %11 {offsets = [0, 256], sizes = [2, 128], strides = [1, 1]} : vector<2x512xf32> to vector<2x128xf32>
    %25 = math.tanh %24 : vector<2x128xf32>
    %26 = vector.extract_strided_slice %11 {offsets = [0, 384], sizes = [2, 128], strides = [1, 1]} : vector<2x512xf32> to vector<2x128xf32>
    %27 = arith.negf %26 : vector<2x128xf32>
    %28 = math.exp %27 : vector<2x128xf32>
    %cst_12 = arith.constant 1.000000e+00 : f32
    %29 = vector.broadcast %cst_12 : f32 to vector<2x128xf32>
    %30 = arith.addf %29, %28 : vector<2x128xf32>
    %31 = arith.divf %29, %30 : vector<2x128xf32>
    %32 = arith.mulf %23, %8 : vector<2x128xf32>
    %33 = arith.mulf %17, %25 : vector<2x128xf32>
    %34 = arith.addf %32, %33 : vector<2x128xf32>
    %35 = math.tanh %34 : vector<2x128xf32>
    %36 = arith.mulf %31, %35 : vector<2x128xf32>
    %37 = vector.extract_strided_slice %6 {offsets = [2, 0], sizes = [2, 512], strides = [1, 1]} : vector<16x512xf32> to vector<2x512xf32>
    %cst_13 = arith.constant dense<0.000000e+00> : vector<2x512xf32>
    %38 = tpu.matmul %36, %0, %cst_13 {dimension_numbers = #tpu.dot_dimension_numbers<[1], [0], [0], [1], [0, 0, 1, 1], [], []>} : vector<2x128xf32>, vector<128x512xf32>, vector<2x512xf32> -> vector<2x512xf32>
    %39 = arith.addf %37, %38 : vector<2x512xf32>
    %40 = vector.extract_strided_slice %39 {offsets = [0, 0], sizes = [2, 128], strides = [1, 1]} : vector<2x512xf32> to vector<2x128xf32>
    %41 = arith.negf %40 : vector<2x128xf32>
    %42 = math.exp %41 : vector<2x128xf32>
    %cst_14 = arith.constant 1.000000e+00 : f32
    %43 = vector.broadcast %cst_14 : f32 to vector<2x128xf32>
    %44 = arith.addf %43, %42 : vector<2x128xf32>
    %45 = arith.divf %43, %44 : vector<2x128xf32>
    %46 = vector.extract_strided_slice %39 {offsets = [0, 128], sizes = [2, 128], strides = [1, 1]} : vector<2x512xf32> to vector<2x128xf32>
    %47 = arith.negf %46 : vector<2x128xf32>
    %48 = math.exp %47 : vector<2x128xf32>
    %cst_15 = arith.constant 1.000000e+00 : f32
    %49 = vector.broadcast %cst_15 : f32 to vector<2x128xf32>
    %50 = arith.addf %49, %48 : vector<2x128xf32>
    %51 = arith.divf %49, %50 : vector<2x128xf32>
    %52 = vector.extract_strided_slice %39 {offsets = [0, 256], sizes = [2, 128], strides = [1, 1]} : vector<2x512xf32> to vector<2x128xf32>
    %53 = math.tanh %52 : vector<2x128xf32>
    %54 = vector.extract_strided_slice %39 {offsets = [0, 384], sizes = [2, 128], strides = [1, 1]} : vector<2x512xf32> to vector<2x128xf32>
    %55 = arith.negf %54 : vector<2x128xf32>
    %56 = math.exp %55 : vector<2x128xf32>
    %cst_16 = arith.constant 1.000000e+00 : f32
    %57 = vector.broadcast %cst_16 : f32 to vector<2x128xf32>
    %58 = arith.addf %57, %56 : vector<2x128xf32>
    %59 = arith.divf %57, %58 : vector<2x128xf32>
    %60 = arith.mulf %51, %34 : vector<2x128xf32>
    %61 = arith.mulf %45, %53 : vector<2x128xf32>
    %62 = arith.addf %60, %61 : vector<2x128xf32>
    %63 = math.tanh %62 : vector<2x128xf32>
    %64 = arith.mulf %59, %63 : vector<2x128xf32>
    %65 = vector.extract_strided_slice %6 {offsets = [4, 0], sizes = [2, 512], strides = [1, 1]} : vector<16x512xf32> to vector<2x512xf32>
    %cst_17 = arith.constant dense<0.000000e+00> : vector<2x512xf32>
    %66 = tpu.matmul %64, %0, %cst_17 {dimension_numbers = #tpu.dot_dimension_numbers<[1], [0], [0], [1], [0, 0, 1, 1], [], []>} : vector<2x128xf32>, vector<128x512xf32>, vector<2x512xf32> -> vector<2x512xf32>
    %67 = arith.addf %65, %66 : vector<2x512xf32>
    %68 = vector.extract_strided_slice %67 {offsets = [0, 0], sizes = [2, 128], strides = [1, 1]} : vector<2x512xf32> to vector<2x128xf32>
    %69 = arith.negf %68 : vector<2x128xf32>
    %70 = math.exp %69 : vector<2x128xf32>
    %cst_18 = arith.constant 1.000000e+00 : f32
    %71 = vector.broadcast %cst_18 : f32 to vector<2x128xf32>
    %72 = arith.addf %71, %70 : vector<2x128xf32>
    %73 = arith.divf %71, %72 : vector<2x128xf32>
    %74 = vector.extract_strided_slice %67 {offsets = [0, 128], sizes = [2, 128], strides = [1, 1]} : vector<2x512xf32> to vector<2x128xf32>
    %75 = arith.negf %74 : vector<2x128xf32>
    %76 = math.exp %75 : vector<2x128xf32>
    %cst_19 = arith.constant 1.000000e+00 : f32
    %77 = vector.broadcast %cst_19 : f32 to vector<2x128xf32>
    %78 = arith.addf %77, %76 : vector<2x128xf32>
    %79 = arith.divf %77, %78 : vector<2x128xf32>
    %80 = vector.extract_strided_slice %67 {offsets = [0, 256], sizes = [2, 128], strides = [1, 1]} : vector<2x512xf32> to vector<2x128xf32>
    %81 = math.tanh %80 : vector<2x128xf32>
    %82 = vector.extract_strided_slice %67 {offsets = [0, 384], sizes = [2, 128], strides = [1, 1]} : vector<2x512xf32> to vector<2x128xf32>
    %83 = arith.negf %82 : vector<2x128xf32>
    %84 = math.exp %83 : vector<2x128xf32>
    %cst_20 = arith.constant 1.000000e+00 : f32
    %85 = vector.broadcast %cst_20 : f32 to vector<2x128xf32>
    %86 = arith.addf %85, %84 : vector<2x128xf32>
    %87 = arith.divf %85, %86 : vector<2x128xf32>
    %88 = arith.mulf %79, %62 : vector<2x128xf32>
    %89 = arith.mulf %73, %81 : vector<2x128xf32>
    %90 = arith.addf %88, %89 : vector<2x128xf32>
    %91 = math.tanh %90 : vector<2x128xf32>
    %92 = arith.mulf %87, %91 : vector<2x128xf32>
    %93 = vector.extract_strided_slice %6 {offsets = [6, 0], sizes = [2, 512], strides = [1, 1]} : vector<16x512xf32> to vector<2x512xf32>
    %cst_21 = arith.constant dense<0.000000e+00> : vector<2x512xf32>
    %94 = tpu.matmul %92, %0, %cst_21 {dimension_numbers = #tpu.dot_dimension_numbers<[1], [0], [0], [1], [0, 0, 1, 1], [], []>} : vector<2x128xf32>, vector<128x512xf32>, vector<2x512xf32> -> vector<2x512xf32>
    %95 = arith.addf %93, %94 : vector<2x512xf32>
    %96 = vector.extract_strided_slice %95 {offsets = [0, 0], sizes = [2, 128], strides = [1, 1]} : vector<2x512xf32> to vector<2x128xf32>
    %97 = arith.negf %96 : vector<2x128xf32>
    %98 = math.exp %97 : vector<2x128xf32>
    %cst_22 = arith.constant 1.000000e+00 : f32
    %99 = vector.broadcast %cst_22 : f32 to vector<2x128xf32>
    %100 = arith.addf %99, %98 : vector<2x128xf32>
    %101 = arith.divf %99, %100 : vector<2x128xf32>
    %102 = vector.extract_strided_slice %95 {offsets = [0, 128], sizes = [2, 128], strides = [1, 1]} : vector<2x512xf32> to vector<2x128xf32>
    %103 = arith.negf %102 : vector<2x128xf32>
    %104 = math.exp %103 : vector<2x128xf32>
    %cst_23 = arith.constant 1.000000e+00 : f32
    %105 = vector.broadcast %cst_23 : f32 to vector<2x128xf32>
    %106 = arith.addf %105, %104 : vector<2x128xf32>
    %107 = arith.divf %105, %106 : vector<2x128xf32>
    %108 = vector.extract_strided_slice %95 {offsets = [0, 256], sizes = [2, 128], strides = [1, 1]} : vector<2x512xf32> to vector<2x128xf32>
    %109 = math.tanh %108 : vector<2x128xf32>
    %110 = vector.extract_strided_slice %95 {offsets = [0, 384], sizes = [2, 128], strides = [1, 1]} : vector<2x512xf32> to vector<2x128xf32>
    %111 = arith.negf %110 : vector<2x128xf32>
    %112 = math.exp %111 : vector<2x128xf32>
    %cst_24 = arith.constant 1.000000e+00 : f32
    %113 = vector.broadcast %cst_24 : f32 to vector<2x128xf32>
    %114 = arith.addf %113, %112 : vector<2x128xf32>
    %115 = arith.divf %113, %114 : vector<2x128xf32>
    %116 = arith.mulf %107, %90 : vector<2x128xf32>
    %117 = arith.mulf %101, %109 : vector<2x128xf32>
    %118 = arith.addf %116, %117 : vector<2x128xf32>
    %119 = math.tanh %118 : vector<2x128xf32>
    %120 = arith.mulf %115, %119 : vector<2x128xf32>
    %121 = vector.extract_strided_slice %6 {offsets = [8, 0], sizes = [2, 512], strides = [1, 1]} : vector<16x512xf32> to vector<2x512xf32>
    %cst_25 = arith.constant dense<0.000000e+00> : vector<2x512xf32>
    %122 = tpu.matmul %120, %0, %cst_25 {dimension_numbers = #tpu.dot_dimension_numbers<[1], [0], [0], [1], [0, 0, 1, 1], [], []>} : vector<2x128xf32>, vector<128x512xf32>, vector<2x512xf32> -> vector<2x512xf32>
    %123 = arith.addf %121, %122 : vector<2x512xf32>
    %124 = vector.extract_strided_slice %123 {offsets = [0, 0], sizes = [2, 128], strides = [1, 1]} : vector<2x512xf32> to vector<2x128xf32>
    %125 = arith.negf %124 : vector<2x128xf32>
    %126 = math.exp %125 : vector<2x128xf32>
    %cst_26 = arith.constant 1.000000e+00 : f32
    %127 = vector.broadcast %cst_26 : f32 to vector<2x128xf32>
    %128 = arith.addf %127, %126 : vector<2x128xf32>
    %129 = arith.divf %127, %128 : vector<2x128xf32>
    %130 = vector.extract_strided_slice %123 {offsets = [0, 128], sizes = [2, 128], strides = [1, 1]} : vector<2x512xf32> to vector<2x128xf32>
    %131 = arith.negf %130 : vector<2x128xf32>
    %132 = math.exp %131 : vector<2x128xf32>
    %cst_27 = arith.constant 1.000000e+00 : f32
    %133 = vector.broadcast %cst_27 : f32 to vector<2x128xf32>
    %134 = arith.addf %133, %132 : vector<2x128xf32>
    %135 = arith.divf %133, %134 : vector<2x128xf32>
    %136 = vector.extract_strided_slice %123 {offsets = [0, 256], sizes = [2, 128], strides = [1, 1]} : vector<2x512xf32> to vector<2x128xf32>
    %137 = math.tanh %136 : vector<2x128xf32>
    %138 = vector.extract_strided_slice %123 {offsets = [0, 384], sizes = [2, 128], strides = [1, 1]} : vector<2x512xf32> to vector<2x128xf32>
    %139 = arith.negf %138 : vector<2x128xf32>
    %140 = math.exp %139 : vector<2x128xf32>
    %cst_28 = arith.constant 1.000000e+00 : f32
    %141 = vector.broadcast %cst_28 : f32 to vector<2x128xf32>
    %142 = arith.addf %141, %140 : vector<2x128xf32>
    %143 = arith.divf %141, %142 : vector<2x128xf32>
    %144 = arith.mulf %135, %118 : vector<2x128xf32>
    %145 = arith.mulf %129, %137 : vector<2x128xf32>
    %146 = arith.addf %144, %145 : vector<2x128xf32>
    %147 = math.tanh %146 : vector<2x128xf32>
    %148 = arith.mulf %143, %147 : vector<2x128xf32>
    %149 = vector.extract_strided_slice %6 {offsets = [10, 0], sizes = [2, 512], strides = [1, 1]} : vector<16x512xf32> to vector<2x512xf32>
    %cst_29 = arith.constant dense<0.000000e+00> : vector<2x512xf32>
    %150 = tpu.matmul %148, %0, %cst_29 {dimension_numbers = #tpu.dot_dimension_numbers<[1], [0], [0], [1], [0, 0, 1, 1], [], []>} : vector<2x128xf32>, vector<128x512xf32>, vector<2x512xf32> -> vector<2x512xf32>
    %151 = arith.addf %149, %150 : vector<2x512xf32>
    %152 = vector.extract_strided_slice %151 {offsets = [0, 0], sizes = [2, 128], strides = [1, 1]} : vector<2x512xf32> to vector<2x128xf32>
    %153 = arith.negf %152 : vector<2x128xf32>
    %154 = math.exp %153 : vector<2x128xf32>
    %cst_30 = arith.constant 1.000000e+00 : f32
    %155 = vector.broadcast %cst_30 : f32 to vector<2x128xf32>
    %156 = arith.addf %155, %154 : vector<2x128xf32>
    %157 = arith.divf %155, %156 : vector<2x128xf32>
    %158 = vector.extract_strided_slice %151 {offsets = [0, 128], sizes = [2, 128], strides = [1, 1]} : vector<2x512xf32> to vector<2x128xf32>
    %159 = arith.negf %158 : vector<2x128xf32>
    %160 = math.exp %159 : vector<2x128xf32>
    %cst_31 = arith.constant 1.000000e+00 : f32
    %161 = vector.broadcast %cst_31 : f32 to vector<2x128xf32>
    %162 = arith.addf %161, %160 : vector<2x128xf32>
    %163 = arith.divf %161, %162 : vector<2x128xf32>
    %164 = vector.extract_strided_slice %151 {offsets = [0, 256], sizes = [2, 128], strides = [1, 1]} : vector<2x512xf32> to vector<2x128xf32>
    %165 = math.tanh %164 : vector<2x128xf32>
    %166 = vector.extract_strided_slice %151 {offsets = [0, 384], sizes = [2, 128], strides = [1, 1]} : vector<2x512xf32> to vector<2x128xf32>
    %167 = arith.negf %166 : vector<2x128xf32>
    %168 = math.exp %167 : vector<2x128xf32>
    %cst_32 = arith.constant 1.000000e+00 : f32
    %169 = vector.broadcast %cst_32 : f32 to vector<2x128xf32>
    %170 = arith.addf %169, %168 : vector<2x128xf32>
    %171 = arith.divf %169, %170 : vector<2x128xf32>
    %172 = arith.mulf %163, %146 : vector<2x128xf32>
    %173 = arith.mulf %157, %165 : vector<2x128xf32>
    %174 = arith.addf %172, %173 : vector<2x128xf32>
    %175 = math.tanh %174 : vector<2x128xf32>
    %176 = arith.mulf %171, %175 : vector<2x128xf32>
    %177 = vector.extract_strided_slice %6 {offsets = [12, 0], sizes = [2, 512], strides = [1, 1]} : vector<16x512xf32> to vector<2x512xf32>
    %cst_33 = arith.constant dense<0.000000e+00> : vector<2x512xf32>
    %178 = tpu.matmul %176, %0, %cst_33 {dimension_numbers = #tpu.dot_dimension_numbers<[1], [0], [0], [1], [0, 0, 1, 1], [], []>} : vector<2x128xf32>, vector<128x512xf32>, vector<2x512xf32> -> vector<2x512xf32>
    %179 = arith.addf %177, %178 : vector<2x512xf32>
    %180 = vector.extract_strided_slice %179 {offsets = [0, 0], sizes = [2, 128], strides = [1, 1]} : vector<2x512xf32> to vector<2x128xf32>
    %181 = arith.negf %180 : vector<2x128xf32>
    %182 = math.exp %181 : vector<2x128xf32>
    %cst_34 = arith.constant 1.000000e+00 : f32
    %183 = vector.broadcast %cst_34 : f32 to vector<2x128xf32>
    %184 = arith.addf %183, %182 : vector<2x128xf32>
    %185 = arith.divf %183, %184 : vector<2x128xf32>
    %186 = vector.extract_strided_slice %179 {offsets = [0, 128], sizes = [2, 128], strides = [1, 1]} : vector<2x512xf32> to vector<2x128xf32>
    %187 = arith.negf %186 : vector<2x128xf32>
    %188 = math.exp %187 : vector<2x128xf32>
    %cst_35 = arith.constant 1.000000e+00 : f32
    %189 = vector.broadcast %cst_35 : f32 to vector<2x128xf32>
    %190 = arith.addf %189, %188 : vector<2x128xf32>
    %191 = arith.divf %189, %190 : vector<2x128xf32>
    %192 = vector.extract_strided_slice %179 {offsets = [0, 256], sizes = [2, 128], strides = [1, 1]} : vector<2x512xf32> to vector<2x128xf32>
    %193 = math.tanh %192 : vector<2x128xf32>
    %194 = vector.extract_strided_slice %179 {offsets = [0, 384], sizes = [2, 128], strides = [1, 1]} : vector<2x512xf32> to vector<2x128xf32>
    %195 = arith.negf %194 : vector<2x128xf32>
    %196 = math.exp %195 : vector<2x128xf32>
    %cst_36 = arith.constant 1.000000e+00 : f32
    %197 = vector.broadcast %cst_36 : f32 to vector<2x128xf32>
    %198 = arith.addf %197, %196 : vector<2x128xf32>
    %199 = arith.divf %197, %198 : vector<2x128xf32>
    %200 = arith.mulf %191, %174 : vector<2x128xf32>
    %201 = arith.mulf %185, %193 : vector<2x128xf32>
    %202 = arith.addf %200, %201 : vector<2x128xf32>
    %203 = math.tanh %202 : vector<2x128xf32>
    %204 = arith.mulf %199, %203 : vector<2x128xf32>
    %205 = vector.extract_strided_slice %6 {offsets = [14, 0], sizes = [2, 512], strides = [1, 1]} : vector<16x512xf32> to vector<2x512xf32>
    %cst_37 = arith.constant dense<0.000000e+00> : vector<2x512xf32>
    %206 = tpu.matmul %204, %0, %cst_37 {dimension_numbers = #tpu.dot_dimension_numbers<[1], [0], [0], [1], [0, 0, 1, 1], [], []>} : vector<2x128xf32>, vector<128x512xf32>, vector<2x512xf32> -> vector<2x512xf32>
    %207 = arith.addf %205, %206 : vector<2x512xf32>
    %208 = vector.extract_strided_slice %207 {offsets = [0, 0], sizes = [2, 128], strides = [1, 1]} : vector<2x512xf32> to vector<2x128xf32>
    %209 = arith.negf %208 : vector<2x128xf32>
    %210 = math.exp %209 : vector<2x128xf32>
    %cst_38 = arith.constant 1.000000e+00 : f32
    %211 = vector.broadcast %cst_38 : f32 to vector<2x128xf32>
    %212 = arith.addf %211, %210 : vector<2x128xf32>
    %213 = arith.divf %211, %212 : vector<2x128xf32>
    %214 = vector.extract_strided_slice %207 {offsets = [0, 128], sizes = [2, 128], strides = [1, 1]} : vector<2x512xf32> to vector<2x128xf32>
    %215 = arith.negf %214 : vector<2x128xf32>
    %216 = math.exp %215 : vector<2x128xf32>
    %cst_39 = arith.constant 1.000000e+00 : f32
    %217 = vector.broadcast %cst_39 : f32 to vector<2x128xf32>
    %218 = arith.addf %217, %216 : vector<2x128xf32>
    %219 = arith.divf %217, %218 : vector<2x128xf32>
    %220 = vector.extract_strided_slice %207 {offsets = [0, 256], sizes = [2, 128], strides = [1, 1]} : vector<2x512xf32> to vector<2x128xf32>
    %221 = math.tanh %220 : vector<2x128xf32>
    %222 = vector.extract_strided_slice %207 {offsets = [0, 384], sizes = [2, 128], strides = [1, 1]} : vector<2x512xf32> to vector<2x128xf32>
    %223 = arith.negf %222 : vector<2x128xf32>
    %224 = math.exp %223 : vector<2x128xf32>
    %cst_40 = arith.constant 1.000000e+00 : f32
    %225 = vector.broadcast %cst_40 : f32 to vector<2x128xf32>
    %226 = arith.addf %225, %224 : vector<2x128xf32>
    %227 = arith.divf %225, %226 : vector<2x128xf32>
    %228 = arith.mulf %219, %202 : vector<2x128xf32>
    %229 = arith.mulf %213, %221 : vector<2x128xf32>
    %230 = arith.addf %228, %229 : vector<2x128xf32>
    %231 = math.tanh %230 : vector<2x128xf32>
    %232 = arith.mulf %227, %231 : vector<2x128xf32>
    %c0_41 = arith.constant 0 : index
    %c0_42 = arith.constant 0 : index
    %233 = vector.load %arg4[%c0_41, %c0_42] : memref<128x1xf32, #tpu.memory_space<vmem>>, vector<128x1xf32>
    %cst_43 = arith.constant dense<0.000000e+00> : vector<2x1xf32>
    %234 = tpu.matmul %232, %233, %cst_43 {dimension_numbers = #tpu.dot_dimension_numbers<[1], [0], [0], [1], [0, 0, 1, 1], [], []>} : vector<2x128xf32>, vector<128x1xf32>, vector<2x1xf32> -> vector<2x1xf32>
    %c0_44 = arith.constant 0 : index
    %c0_45 = arith.constant 0 : index
    %235 = vector.load %arg5[%c0_44, %c0_45] : memref<1x1xf32, #tpu.memory_space<vmem>>, vector<1x1xf32>
    %236 = vector.broadcast %235 : vector<1x1xf32> to vector<2x1xf32>
    %237 = arith.addf %234, %236 : vector<2x1xf32>
    %c0_46 = arith.constant 0 : index
    %c0_47 = arith.constant 0 : index
    %238 = vector.load %arg6[%c0_46, %c0_47] : memref<2x1xf32, #tpu.memory_space<vmem>>, vector<2x1xf32>
    tpu.vector_store %arg6[%c0_46, %c0_47], %237 {strides = array<i32>} : memref<2x1xf32, #tpu.memory_space<vmem>>, vector<2x1xf32>,
    return
  }
}

</mosaic_0001>

<bundles_post_ra>
// kernel: tpu_custom_call.1
= control target key start
LH: loop header
LB: loop body
LE: loop exit
PB: predicated region body
PF: predicated region fallthrough
CT: control target
= control target key end

     0   :  { %s3214_s0 = inlined_call_operand.vmem [shape: f32[16,5], index: 0, kind: input, shape index: {}]   ;;  %s3215_s1 = inlined_call_operand.vmem [shape: f32[5,512], index: 1, kind: input, shape index: {}]   ;;  %s3216_s2 = inlined_call_operand.hbm [shape: f32[128,512], index: 2, kind: input, shape index: {}]   ;;  %s3217_s3 = inlined_call_operand.vmem [shape: f32[1,512], index: 3, kind: input, shape index: {}]   ;;  %s3218_s4 = inlined_call_operand.vmem [shape: f32[128,1], index: 4, kind: input, shape index: {}]   ;;  %s3219_s5 = inlined_call_operand.<no memory space> [shape: f32[1,1], index: 5, kind: input, shape index: {}]   ;;  %s3220_s6 = inlined_call_operand.vmem [shape: f32[2,1], index: 6, kind: output, shape index: {}]  }
   0x1   :  { %v11_v0 = vstv %s3219_s5 }
   0x2   :  { %12 = vst [vmem:[#allocation2] sm:$0x1] %v11_v0 }
   0x3   :  { %13 = vsyncpa [#allocation4], 0  ;;  %s2655_s23 = smov [#allocation3]   ;;  %s2631_s27 = scalar_lea.hbm %s3216_s2, 8192 }
   0x4   :  { %s23_s24 = sshll.u32 %s2655_s23, 4  ;;  %p2632_p0 = scmp.ne.s32.totalorder %s3216_s2, %s2631_s27  ;;  %s24_s24 = int_to_ptr.vmem [resolvable:$true] %s23_s24 }
   0x5   :  { %p2635_p1 = scmp.lt.u32.totalorder %s2631_s27, %s3216_s2 }
   0x7   :  { %p2637_p2 = pnand %p2635_p1, %p2632_p0 }
   0x9   :  { %2640 = shalt.err (!%p2637_p2)
}
   0xa   :  { %s2641_s5 = scalar_lea.vmem %s24_s24, 8192  ;;  %p2646_p4 = scmp.lt.s32.totalorder %s24_s24, %s24_s24 }
   0xb   :  { %p2642_p3 = scmp.ne.s32.totalorder %s24_s24, %s2641_s5  ;;  %p2647_p5 = scmp.lt.s32.totalorder %s2641_s5, %s2641_s5 }
   0xd   :  { %p2648_p6 = por %p2647_p5, %p2646_p4 }
   0xf   :  { %p2649_p7 = pnand %p2648_p6, %p2642_p3 }
  0x11   :  { %2652 = shalt.err (!%p2649_p7)
}
  0x12   :  { %s2656_s8 = smov 512   ;;  %s2657_s9 = smov 32  }
  0x13   :  { %29 = dma.hbm_to_vmem [thread:$0]  %s3216_s2, 8192, %s24_s24, [#allocation4], %s2656_s8, %s2656_s8, %s2657_s9  }
  0x14   :  { %2653 = dma.done.wait [#allocation4], 8192  }
  0x15   :  { %2654 = vsyncadd [#allocation4], 4294959104  ;;  %v2658_v1 = vmov 0.0   ;;  %vm138_vm0 = vcmask 1044480   ;;  %v106_v2 = vld [vmem:[%s3215_s1 + $0x8] sm:$0x1f] }
  0x16   :  { %215 = vmatprep.mubr.f32.mxu1 %v2658_v1  ;;  %369 = vmatprep.mubr.f32.mxu0 %v2658_v1  ;;  %v105_v3 = vld [vmem:[%s3215_s1] sm:$0x1f]  ;;  %vm131_vm1 = vcmask 39936   ;;  %v40_v5 = vld [vmem:[#allocation3 + $0x8] sm:$0xff]  ;;  %v108_v14 = vld [vmem:[%s3215_s1 + $0x18] sm:$0x1f] }
  0x17   :  { %v103_v4 = vld [vmem:[%s3214_s0] sm:$0xff]  ;;  %1876 = vmatprep.subr.msk.mxu1 %vm138_vm0, %v106_v2  ;;  %v44_v6 = vld [vmem:[#allocation3 + $0x28] sm:$0xff]  ;;  %v41_v26 = vld [vmem:[#allocation3 + $0x10] sm:$0xff]  ;;  %vm2660_vm2 = vmmov 0   ;;  %vm1869_vm3 = vcmask 1024  }
  0x18   :  { %v39_v7 = vld [vmem:[#allocation3] sm:$0xff]  ;;  %1877 = vmatpush1.msk.msra.mxu1 %vm138_vm0, %v105_v3  ;;  %v2724_v8 = vpack.c.bf16 %v44_v6, %v40_v5  ;;  %v48_v11 = vld [vmem:[#allocation3 + $0x48] sm:$0xff]  ;;  %v42_v19 = vld [vmem:[#allocation3 + $0x18] sm:$0xff] }
  0x19   :  { %v43_v9 = vld [vmem:[#allocation3 + $0x20] sm:$0xff]  ;;  %1878 = vmatmul.mubr.msk.f32.vlgmr.msra.gmra.mrb[0].mxu1 %vm131_vm1, %v103_v4  ;;  %v52_v13 = vld [vmem:[#allocation3 + $0x68] sm:$0xff]  ;;  %1880 = vmatprep.subr.msk.mxu1 %vm138_vm0, %v108_v14  ;;  %v46_v21 = vld [vmem:[#allocation3 + $0x38] sm:$0xff] }
  0x1a   :  { %v2729_v10 = vld [vmem:[%s3214_s0 + $0x8] sm:$0xff]  ;;  %v2732_v12 = vpack.c.bf16 %v43_v9, %v39_v7  ;;  %1962 = vmatprep.subr.bf16.mxu0 %v2724_v8  ;;  %221 = vmatprep.mubr.f32.mxu1 %v2658_v1  ;;  %v2739_v16 = vpack.c.bf16 %v52_v13, %v48_v11  ;;  %v107_v18 = vld [vmem:[%s3215_s1 + $0x10] sm:$0x1f]  ;;  %v2750_v24 = vpack.c.bf16 %v46_v21, %v42_v19  ;;  %v50_v30 = vld [vmem:[#allocation3 + $0x58] sm:$0xff] }
  0x1b   :  { %v47_v15 = vld [vmem:[#allocation3 + $0x40] sm:$0xff]  ;;  %v56_v22 = vld [vmem:[#allocation3 + $0x88] sm:$0xff]  ;;  %1881 = vmatpush1.msk.msra.mxu1 %vm138_vm0, %v107_v18  ;;  %v45_v27 = vld [vmem:[#allocation3 + $0x30] sm:$0xff] }
  0x1c   :  { %v51_v17 = vld [vmem:[#allocation3 + $0x60] sm:$0xff]  ;;  %1964 = vmatpush1.bf16.msra.mxu0 %v2732_v12  ;;  %v60_v23 = vld [vmem:[#allocation3 + $0xa8] sm:$0xff]  ;;  %v54_v31 = vld [vmem:[#allocation3 + $0x78] sm:$0xff]  ;;  %1994 = vmatprep.subr.bf16.mxu1 %v2750_v24  ;;  %v2758_v32 = vpack.c.bf16 %v45_v27, %v41_v26 }
  0x1d   :  { %v2746_v20 = vpack.c.bf16 %v51_v17, %v47_v15  ;;  %1966 = vmatprep.subr.bf16.mxu0 %v2739_v16  ;;  %v2752_v25 = vpack.c.bf16 %v60_v23, %v56_v22  ;;  %v55_v28 = vld [vmem:[#allocation3 + $0x80] sm:$0xff]  ;;  %1879 = vmatmul.mubr.msk.f32.gmra.mrb[2].mxu1 %vm131_vm1, %v2729_v10  ;;  %v64_v33 = vld [vmem:[#allocation3 + $0xc8] sm:$0xff]  ;;  %v2763_v36 = vpack.c.bf16 %v54_v31, %v50_v30  ;;  %v49_v37 = vld [vmem:[#allocation3 + $0x50] sm:$0xff] }
  0x1e   :  { %v59_v29 = vld [vmem:[#allocation3 + $0xa0] sm:$0xff]  ;;  %292 = vmatprep.mubr.f32.mxu1 %v2658_v1  ;;  %v68_v34 = vld [vmem:[#allocation3 + $0xe8] sm:$0xff]  ;;  %v53_v38 = vld [vmem:[#allocation3 + $0x70] sm:$0xff] }
  0x1f   :  { %v2761_v35 = vpack.c.bf16 %v59_v29, %v55_v28  ;;  %v63_v39 = vld [vmem:[#allocation3 + $0xc0] sm:$0xff]  ;;  %v2766_v40 = vpack.c.bf16 %v68_v34, %v64_v33  ;;  %v58_v42 = vld [vmem:[#allocation3 + $0x98] sm:$0xff]  ;;  %v72_v44 = vld [vmem:[#allocation3 + $0x108] sm:$0xff]  ;;  %v2770_v46 = vpack.c.bf16 %v53_v38, %v49_v37 }
  0x20   :  { %1968 = vmatpush1.bf16.msra.mxu0 %v2746_v20  ;;  %v67_v41 = vld [vmem:[#allocation3 + $0xe0] sm:$0xff]  ;;  %v62_v43 = vld [vmem:[#allocation3 + $0xb8] sm:$0xff]  ;;  %v76_v45 = vld [vmem:[#allocation3 + $0x128] sm:$0xff] }
  0x21   :  { %1970 = vmatprep.subr.bf16.mxu0 %v2752_v25  ;;  %1882 = vmatmul.mubr.msk.f32.vlgmr.msra.gmra.mrb[4].mxu1 %vm131_vm1, %v103_v4  ;;  %v2775_v47 = vpack.c.bf16 %v67_v41, %v63_v39  ;;  %v2777_v48 = vpack.c.bf16 %v62_v43, %v58_v42  ;;  %v57_v49 = vld [vmem:[#allocation3 + $0x90] sm:$0xff]  ;;  %v71_v51 = vld [vmem:[#allocation3 + $0x100] sm:$0xff]  ;;  %v2780_v52 = vpack.c.bf16 %v76_v45, %v72_v44  ;;  %v66_v54 = vld [vmem:[#allocation3 + $0xd8] sm:$0xff] }
  0x22   :  { %1996 = vmatpush1.bf16.msra.mxu1 %v2758_v32  ;;  %298 = vmatprep.mubr.f32.mxu1 %v2658_v1  ;;  %v61_v50 = vld [vmem:[#allocation3 + $0xb0] sm:$0xff]  ;;  %v75_v53 = vld [vmem:[#allocation3 + $0x120] sm:$0xff]  ;;  %v70_v55 = vld [vmem:[#allocation3 + $0xf8] sm:$0xff] }
  0x23   :  { %1998 = vmatprep.subr.bf16.mxu1 %v2763_v36  ;;  %v80_v56 = vld [vmem:[#allocation3 + $0x148] sm:$0xff]  ;;  %v2785_v58 = vpack.c.bf16 %v61_v50, %v57_v49  ;;  %v2790_v59 = vpack.c.bf16 %v75_v53, %v71_v51  ;;  %v2792_v60 = vpack.c.bf16 %v70_v55, %v66_v54  ;;  %v65_v61 = vld [vmem:[#allocation3 + $0xd0] sm:$0xff]  ;;  %v79_v63 = vld [vmem:[#allocation3 + $0x140] sm:$0xff]  ;;  %v111_v55 = vlaneseq }
  0x24   :  { %1972 = vmatpush1.bf16.msra.mxu0 %v2761_v35  ;;  %v84_v57 = vld [vmem:[#allocation3 + $0x168] sm:$0xff]  ;;  %v69_v62 = vld [vmem:[#allocation3 + $0xf0] sm:$0xff]  ;;  %v83_v2 = vld [vmem:[#allocation3 + $0x160] sm:$0xff] }
  0x25   :  { %1974 = vmatprep.subr.bf16.mxu0 %v2766_v40  ;;  %1883 = vmatmul.mubr.msk.f32.gmra.mrb[6].mxu1 %vm131_vm1, %v2729_v10  ;;  %v2795_v0 = vpack.c.bf16 %v84_v57, %v80_v56  ;;  %v74_v3 = vld [vmem:[#allocation3 + $0x118] sm:$0xff]  ;;  %v88_v5 = vld [vmem:[#allocation3 + $0x188] sm:$0xff]  ;;  %v2798_v7 = vpack.c.bf16 %v69_v62, %v65_v61  ;;  %v2802_v9 = vpack.c.bf16 %v83_v2, %v79_v63  ;;  %v73_v11 = vld [vmem:[#allocation3 + $0x110] sm:$0xff]  ;;  %v112_v56 = vshrl.u32 %v111_v55, 7 }
  0x26   :  { %2000 = vmatpush1.bf16.msra.mxu1 %v2770_v46  ;;  %440 = vmatprep.mubr.f32.mxu1 %v2658_v1  ;;  %v78_v4 = vld [vmem:[#allocation3 + $0x138] sm:$0xff]  ;;  %v92_v6 = vld [vmem:[#allocation3 + $0x1a8] sm:$0xff]  ;;  %v77_v13 = vld [vmem:[#allocation3 + $0x130] sm:$0xff] }
  0x27   :  { %2002 = vmatprep.subr.bf16.mxu1 %v2777_v48  ;;  %v2804_v10 = vpack.c.bf16 %v78_v4, %v74_v3  ;;  %v87_v14 = vld [vmem:[#allocation3 + $0x180] sm:$0xff]  ;;  %v2807_v15 = vpack.c.bf16 %v92_v6, %v88_v5  ;;  %v82_v18 = vld [vmem:[#allocation3 + $0x158] sm:$0xff]  ;;  %v96_v21 = vld [vmem:[#allocation3 + $0x1c8] sm:$0xff]  ;;  %v2810_v23 = vpack.c.bf16 %v77_v13, %v73_v11  ;;  %v113_v57 = vsub.s32 0, %v112_v56 }
  0x28   :  { %1976 = vmatpush1.bf16.msra.mxu0 %v2775_v47  ;;  %v91_v17 = vld [vmem:[#allocation3 + $0x1a0] sm:$0xff]  ;;  %v86_v19 = vld [vmem:[#allocation3 + $0x178] sm:$0xff]  ;;  %v100_v22 = vld [vmem:[#allocation3 + $0x1e8] sm:$0xff]  ;;  %v117_v63 = vsub.s32 1, %v112_v56 }
  0x29   :  { %1978 = vmatprep.subr.bf16.mxu0 %v2780_v52  ;;  %v2814_v26 = vpack.c.bf16 %v91_v17, %v87_v14  ;;  %v2816_v27 = vpack.c.bf16 %v86_v19, %v82_v18  ;;  %v81_v28 = vld [vmem:[#allocation3 + $0x150] sm:$0xff]  ;;  %v95_v30 = vld [vmem:[#allocation3 + $0x1c0] sm:$0xff]  ;;  %v2819_v31 = vpack.c.bf16 %v100_v22, %v96_v21  ;;  %v90_v34 = vld [vmem:[#allocation3 + $0x198] sm:$0xff]  ;;  %v121_v14 = vsub.s32 2, %v112_v56 }
  0x2a   :  { %2004 = vmatpush1.bf16.msra.mxu1 %v2785_v58  ;;  %v85_v29 = vld [vmem:[#allocation3 + $0x170] sm:$0xff]  ;;  %v99_v33 = vld [vmem:[#allocation3 + $0x1e0] sm:$0xff]  ;;  %v94_v37 = vld [vmem:[#allocation3 + $0x1b8] sm:$0xff]  ;;  %v125_v18 = vsub.s32 3, %v112_v56 }
  0x2b   :  { %2006 = vmatprep.subr.bf16.mxu1 %v2792_v60  ;;  %v2822_v38 = vpack.c.bf16 %v85_v29, %v81_v28  ;;  %v2826_v39 = vpack.c.bf16 %v99_v33, %v95_v30  ;;  %v2828_v41 = vpack.c.bf16 %v94_v37, %v90_v34  ;;  %v89_v42 = vld [vmem:[#allocation3 + $0x190] sm:$0xff]  ;;  %v98_v44 = vld [vmem:[#allocation3 + $0x1d8] sm:$0xff] }
  0x2c   :  { %1980 = vmatpush1.bf16.msra.mxu0 %v2790_v59  ;;  %v93_v43 = vld [vmem:[#allocation3 + $0x1b0] sm:$0xff]  ;;  %v102_v45 = vld [vmem:[#allocation3 + $0x1f8] sm:$0xff] }
  0x2d   :  { %1982 = vmatprep.subr.bf16.mxu0 %v2795_v0  ;;  %v2832_v49 = vpack.c.bf16 %v93_v43, %v89_v42  ;;  %v2836_v50 = vpack.c.bf16 %v102_v45, %v98_v44  ;;  %v97_v51 = vld [vmem:[#allocation3 + $0x1d0] sm:$0xff]  ;;  %v109_v61 = vld [vmem:[%s3217_s3] sm:$0xf] }
  0x2e   :  { %2008 = vmatpush1.bf16.msra.mxu1 %v2798_v7  ;;  %v101_v53 = vld [vmem:[#allocation3 + $0x1f0] sm:$0xff]  ;;  %v114_v3 = vrot.slane %v109_v61, %v113_v57  ;;  %v118_v4 = vrot.slane %v109_v61, %v117_v63  ;;  %v122_v21 = vrot.slane %v109_v61, %v121_v14  ;;  %v126_v22 = vrot.slane %v109_v61, %v125_v18 }
  0x2f   :  { %2010 = vmatprep.subr.bf16.mxu1 %v2804_v10  ;;  %v2841_v54 = vpack.c.bf16 %v101_v53, %v97_v51 }
  0x30   :  { %1984 = vmatpush1.bf16.msra.mxu0 %v2802_v9 }
  0x31   :  { %1986 = vmatprep.subr.bf16.mxu0 %v2807_v15 }
  0x32   :  { %2012 = vmatpush1.bf16.msra.mxu1 %v2810_v23 }
  0x33   :  { %2014 = vmatprep.subr.bf16.mxu1 %v2816_v27 }
  0x34   :  { %1988 = vmatpush1.bf16.msra.mxu0 %v2814_v26 }
  0x35   :  { %1990 = vmatprep.subr.bf16.mxu0 %v2819_v31 }
  0x36   :  { %2016 = vmatpush1.bf16.msra.mxu1 %v2822_v38 }
  0x37   :  { %2018 = vmatprep.subr.bf16.mxu1 %v2828_v41 }
  0x38   :  { %1992 = vmatpush1.bf16.msra.mxu0 %v2826_v39 }
  0x39   :  { %2026 = vmatprep.subr.bf16.mxu0 %v2724_v8 }
  0x3a   :  { %2020 = vmatpush1.bf16.msra.mxu1 %v2832_v49 }
  0x3b   :  { %370 = vmatmul.mubr.f32.vlgmr.msra.gmra.mrb[0].mxu0 %v2658_v1  ;;  %2022 = vmatprep.subr.bf16.mxu1 %v2836_v50 }
  0x3c   :  { %2028 = vmatpush1.bf16.msra.mxu0 %v2732_v12  ;;  %539 = vmatprep.mubr.f32.mxu0 %v2658_v1 }
  0x3d   :  { %2030 = vmatprep.subr.bf16.mxu0 %v2739_v16 }
  0x3e   :  { %2024 = vmatpush1.bf16.msra.mxu1 %v2841_v54 }
  0x3f   :  { %2058 = vmatprep.subr.bf16.mxu1 %v2750_v24 }
  0x40   :  { %2032 = vmatpush1.bf16.msra.mxu0 %v2746_v20 }
  0x41   :  { %2034 = vmatprep.subr.bf16.mxu0 %v2752_v25  ;;  %441 = vmatmul.mubr.f32.vlgmr.msra.gmra.mrb[8].mxu1 %v2658_v1 }
  0x42   :  { %2060 = vmatpush1.bf16.msra.mxu1 %v2758_v32  ;;  %610 = vmatprep.mubr.f32.mxu1 %v2658_v1 }
  0x43   :  { %2062 = vmatprep.subr.bf16.mxu1 %v2763_v36 }
  0x44   :  { %2036 = vmatpush1.bf16.msra.mxu0 %v2761_v35 }
  0x45   :  { %2038 = vmatprep.subr.bf16.mxu0 %v2766_v40 }
  0x46   :  { %2064 = vmatpush1.bf16.msra.mxu1 %v2770_v46 }
  0x47   :  { %2066 = vmatprep.subr.bf16.mxu1 %v2777_v48 }
  0x48   :  { %2040 = vmatpush1.bf16.msra.mxu0 %v2775_v47 }
  0x49   :  { %2042 = vmatprep.subr.bf16.mxu0 %v2780_v52 }
  0x4a   :  { %2068 = vmatpush1.bf16.msra.mxu1 %v2785_v58 }
  0x4b   :  { %2070 = vmatprep.subr.bf16.mxu1 %v2792_v60 }
  0x4c   :  { %2044 = vmatpush1.bf16.msra.mxu0 %v2790_v59 }
  0x4d   :  { %2046 = vmatprep.subr.bf16.mxu0 %v2795_v0 }
  0x4e   :  { %2072 = vmatpush1.bf16.msra.mxu1 %v2798_v7 }
  0x4f   :  { %2074 = vmatprep.subr.bf16.mxu1 %v2804_v10 }
  0x50   :  { %2048 = vmatpush1.bf16.msra.mxu0 %v2802_v9 }
  0x51   :  { %2050 = vmatprep.subr.bf16.mxu0 %v2807_v15 }
  0x52   :  { %2076 = vmatpush1.bf16.msra.mxu1 %v2810_v23 }
  0x53   :  { %2078 = vmatprep.subr.bf16.mxu1 %v2816_v27 }
  0x54   :  { %2052 = vmatpush1.bf16.msra.mxu0 %v2814_v26 }
  0x55   :  { %2054 = vmatprep.subr.bf16.mxu0 %v2819_v31 }
  0x56   :  { %2080 = vmatpush1.bf16.msra.mxu1 %v2822_v38 }
  0x57   :  { %2082 = vmatprep.subr.bf16.mxu1 %v2828_v41 }
  0x58   :  { %2056 = vmatpush1.bf16.msra.mxu0 %v2826_v39 }
  0x59   :  { %2090 = vmatprep.subr.bf16.mxu0 %v2724_v8 }
  0x5a   :  { %2084 = vmatpush1.bf16.msra.mxu1 %v2832_v49 }
  0x5b   :  { %2086 = vmatprep.subr.bf16.mxu1 %v2836_v50 }
  0x5e   :  { %2088 = vmatpush1.bf16.msra.mxu1 %v2841_v54 }
  0x5f   :  { %2122 = vmatprep.subr.bf16.mxu1 %v2750_v24 }
  0xec   :  { %v217_v62 = vpop.f32.mrb[0].mxu1 }
  0xed   :  { %v219_v2 = vpop.f32.mrb[1].mxu1  ;;  %v2892_v34 = vadd.f32 %v217_v62, %v114_v3 }
  0xee   :  { %v2894_v37 = vadd.f32 %v219_v2, %v118_v4 }
  0xf0   :  { %v223_v5 = vpop.f32.mrb[2].mxu1 }
  0xf1   :  { %v2884_v6 = vadd.f32 %v223_v5, %v114_v3  ;;  %v225_v11 = vpop.f32.mrb[3].mxu1 }
  0xf2   :  { %v2886_v13 = vadd.f32 %v225_v11, %v118_v4 }
  0xf4   :  { %v294_v17 = vpop.f32.mrb[4].mxu1 }
  0xf5   :  { %v296_v19 = vpop.f32.mrb[5].mxu1  ;;  %v2901_v62 = vadd.f32 %v294_v17, %v122_v21 }
  0xf6   :  { %v2898_v55 = vadd.f32 %v296_v19, %v126_v22 }
  0xf8   :  { %v300_v28 = vpop.f32.mrb[6].mxu1 }
  0xf9   :  { %v2888_v29 = vadd.f32 %v300_v28, %v122_v21  ;;  %v302_v30 = vpop.f32.mrb[7].mxu1 }
  0xfa   :  { %v2890_v33 = vadd.f32 %v302_v30, %v126_v22 }
 0x10e   :  { %v371_v42 = vpop.f32.mrb[0].mxu0 }
 0x10f   :  { %v447_v43 = vadd.f32 %v371_v42, %v2892_v34  ;;  %v373_v44 = vpop.f32.mrb[1].mxu0 }
 0x110   :  { %v448_v45 = vadd.f32 %v373_v44, %v2894_v37 }
 0x111   :  { %v1884_v51 = vmul.f32 -1.442695, %v447_v43 }
 0x112   :  { %v1885_v53 = vmul.f32 -1.442695, %v448_v45 }
 0x113   :  { %2503 = vpow2.f32 %v1884_v51 }
 0x114   :  { %2505 = vpow2.f32 %v1885_v53  ;;  %v442_v56 = vpop.f32.mrb[8].mxu1 }
 0x115   :  { %v444_v57 = vpop.f32.mrb[9].mxu1  ;;  %v449_v2 = vadd.f32 %v442_v56, %v2901_v62 }
 0x116   :  { %v450_v61 = vadd.f32 %v444_v57, %v2898_v55 }
 0x118   :  { %v1886_v63 = vmul.f32 -1.442695, %v450_v61 }
 0x11a   :  { %2507 = vpow2.f32 %v1886_v63 }
 0x11b   :  { %2509 = vtanh.f32 %v449_v2 }
 0x11d   :  { %v2504_v3 = vpop.eup %2503 }
 0x11e   :  { %v2506_v4 = vpop.eup %2505  ;;  %v454_v5 = vadd.f32 1.0, %v2504_v3 }
 0x11f   :  { %v460_v11 = vadd.f32 1.0, %v2506_v4 }
 0x120   :  { %2511 = vrcp.f32 %v454_v5 }
 0x121   :  { %2513 = vrcp.f32 %v460_v11 }
 0x124   :  { %v2508_v14 = vpop.eup %2507 }
 0x125   :  { %v2510_v18 = vpop.eup %2509  ;;  %v467_v30 = vadd.f32 1.0, %v2508_v14 }
 0x127   :  { %2515 = vrcp.f32 %v467_v30 }
 0x12a   :  { %v2512_v19 = vpop.eup %2511 }
 0x12b   :  { %v2514_v22 = vpop.eup %2513  ;;  %v471_v28 = vmul.f32 %v2512_v19, %v2510_v18 }
 0x12c   :  { %v470_v42 = vmul.f32 0.0, %v2514_v22 }
 0x12e   :  { %v2904_v17 = vadd.f32 %v471_v28, %v470_v42 }
 0x130   :  { %2517 = vtanh.f32 %v2904_v17 }
 0x131   :  { %v2516_v21 = vpop.eup %2515 }
 0x13a   :  { %v2518_v43 = vpop.eup %2517 }
 0x13b   :  { %v474_v44 = vmul.f32 %v2518_v43, %v2516_v21 }
 0x13d   :  { %540 = vmatmul.mubr.f32.vlgmr.msra.gmra.mrb[2].mxu0 %v474_v44  ;;  %611 = vmatmul.mubr.f32.vlgmr.msra.gmra.mrb[10].mxu1 %v474_v44 }
 0x13e   :  { %2092 = vmatpush1.bf16.msra.mxu0 %v2732_v12  ;;  %2124 = vmatpush1.bf16.msra.mxu1 %v2758_v32 }
 0x13f   :  { %2094 = vmatprep.subr.bf16.mxu0 %v2739_v16  ;;  %2126 = vmatprep.subr.bf16.mxu1 %v2763_v36 }
 0x140   :  { %727 = vmatprep.mubr.f32.mxu0 %v2658_v1  ;;  %798 = vmatprep.mubr.f32.mxu1 %v2658_v1 }
 0x142   :  { %2096 = vmatpush1.bf16.msra.mxu0 %v2746_v20  ;;  %2128 = vmatpush1.bf16.msra.mxu1 %v2770_v46 }
 0x143   :  { %2098 = vmatprep.subr.bf16.mxu0 %v2752_v25  ;;  %2130 = vmatprep.subr.bf16.mxu1 %v2777_v48 }
 0x146   :  { %2100 = vmatpush1.bf16.msra.mxu0 %v2761_v35  ;;  %2132 = vmatpush1.bf16.msra.mxu1 %v2785_v58 }
 0x147   :  { %2102 = vmatprep.subr.bf16.mxu0 %v2766_v40  ;;  %2134 = vmatprep.subr.bf16.mxu1 %v2792_v60 }
 0x14a   :  { %2104 = vmatpush1.bf16.msra.mxu0 %v2775_v47  ;;  %2136 = vmatpush1.bf16.msra.mxu1 %v2798_v7 }
 0x14b   :  { %2106 = vmatprep.subr.bf16.mxu0 %v2780_v52  ;;  %2138 = vmatprep.subr.bf16.mxu1 %v2804_v10 }
 0x14e   :  { %2108 = vmatpush1.bf16.msra.mxu0 %v2790_v59  ;;  %2140 = vmatpush1.bf16.msra.mxu1 %v2810_v23 }
 0x14f   :  { %2110 = vmatprep.subr.bf16.mxu0 %v2795_v0  ;;  %2142 = vmatprep.subr.bf16.mxu1 %v2816_v27 }
 0x152   :  { %2112 = vmatpush1.bf16.msra.mxu0 %v2802_v9  ;;  %2144 = vmatpush1.bf16.msra.mxu1 %v2822_v38 }
 0x153   :  { %2114 = vmatprep.subr.bf16.mxu0 %v2807_v15  ;;  %2146 = vmatprep.subr.bf16.mxu1 %v2828_v41 }
 0x156   :  { %2116 = vmatpush1.bf16.msra.mxu0 %v2814_v26  ;;  %2148 = vmatpush1.bf16.msra.mxu1 %v2832_v49 }
 0x157   :  { %2118 = vmatprep.subr.bf16.mxu0 %v2819_v31  ;;  %2150 = vmatprep.subr.bf16.mxu1 %v2836_v50 }
 0x15a   :  { %2120 = vmatpush1.bf16.msra.mxu0 %v2826_v39  ;;  %2152 = vmatpush1.bf16.msra.mxu1 %v2841_v54 }
 0x15b   :  { %2154 = vmatprep.subr.bf16.mxu0 %v2724_v8  ;;  %2186 = vmatprep.subr.bf16.mxu1 %v2750_v24 }
 0x210   :  { %v541_v45 = vpop.f32.mrb[2].mxu0  ;;  %v612_v51 = vpop.f32.mrb[10].mxu1 }
 0x211   :  { %v621_v53 = vrot.slane %v541_v45, 6  ;;  %v543_v56 = vpop.f32.mrb[3].mxu0  ;;  %v614_v57 = vpop.f32.mrb[11].mxu1  ;;  %v623_v14 = vrot.slane %v612_v51, 6  ;;  %v653_v45 = vrot.slane %v2904_v17, 6 }
 0x212   :  { %v622_v61 = vrot.slane %v543_v56, 6  ;;  %v624_v5 = vrot.slane %v614_v57, 6 }
 0x213   :  { %v629_v63 = vadd.f32 %v621_v53, %v2892_v34  ;;  %v631_v19 = vadd.f32 %v623_v14, %v2901_v62 }
 0x214   :  { %v630_v2 = vadd.f32 %v622_v61, %v2894_v37  ;;  %v632_v11 = vadd.f32 %v624_v5, %v2898_v55 }
 0x215   :  { %v1887_v3 = vmul.f32 -1.442695, %v629_v63 }
 0x216   :  { %v1888_v4 = vmul.f32 -1.442695, %v630_v2  ;;  %v1889_v18 = vmul.f32 -1.442695, %v632_v11 }
 0x217   :  { %2519 = vpow2.f32 %v1887_v3 }
 0x218   :  { %2521 = vpow2.f32 %v1888_v4 }
 0x219   :  { %2523 = vpow2.f32 %v1889_v18 }
 0x21a   :  { %2525 = vtanh.f32 %v631_v19 }
 0x221   :  { %v2520_v22 = vpop.eup %2519 }
 0x222   :  { %v2522_v28 = vpop.eup %2521  ;;  %v636_v30 = vadd.f32 1.0, %v2520_v22 }
 0x223   :  { %v642_v42 = vadd.f32 1.0, %v2522_v28  ;;  %v2524_v21 = vpop.eup %2523 }
 0x224   :  { %2527 = vrcp.f32 %v636_v30  ;;  %v2526_v43 = vpop.eup %2525  ;;  %v649_v57 = vadd.f32 1.0, %v2524_v21 }
 0x225   :  { %2529 = vrcp.f32 %v642_v42 }
 0x226   :  { %2531 = vrcp.f32 %v649_v57 }
 0x22e   :  { %v2528_v44 = vpop.eup %2527 }
 0x22f   :  { %v2530_v53 = vpop.eup %2529  ;;  %v656_v56 = vmul.f32 %v2528_v44, %v2526_v43 }
 0x230   :  { %v655_v51 = vmul.f32 %v2530_v53, %v653_v45  ;;  %v2532_v63 = vpop.eup %2531 }
 0x232   :  { %v2946_v61 = vadd.f32 %v656_v56, %v655_v51 }
 0x234   :  { %2533 = vtanh.f32 %v2946_v61 }
 0x23e   :  { %v2534_v2 = vpop.eup %2533 }
 0x23f   :  { %v659_v3 = vmul.f32 %v2534_v2, %v2532_v63 }
 0x241   :  { %v661_v4 = vrot.slane %v659_v3, 2 }
 0x243   :  { %728 = vmatmul.mubr.f32.vlgmr.msra.gmra.mrb[4].mxu0 %v661_v4  ;;  %799 = vmatmul.mubr.f32.vlgmr.msra.gmra.mrb[12].mxu1 %v661_v4 }
 0x244   :  { %2156 = vmatpush1.bf16.msra.mxu0 %v2732_v12  ;;  %2188 = vmatpush1.bf16.msra.mxu1 %v2758_v32 }
 0x245   :  { %2158 = vmatprep.subr.bf16.mxu0 %v2739_v16  ;;  %2190 = vmatprep.subr.bf16.mxu1 %v2763_v36 }
 0x246   :  { %915 = vmatprep.mubr.f32.mxu0 %v2658_v1  ;;  %986 = vmatprep.mubr.f32.mxu1 %v2658_v1 }
 0x248   :  { %2160 = vmatpush1.bf16.msra.mxu0 %v2746_v20  ;;  %2192 = vmatpush1.bf16.msra.mxu1 %v2770_v46 }
 0x249   :  { %2162 = vmatprep.subr.bf16.mxu0 %v2752_v25  ;;  %2194 = vmatprep.subr.bf16.mxu1 %v2777_v48 }
 0x24c   :  { %2164 = vmatpush1.bf16.msra.mxu0 %v2761_v35  ;;  %2196 = vmatpush1.bf16.msra.mxu1 %v2785_v58 }
 0x24d   :  { %2166 = vmatprep.subr.bf16.mxu0 %v2766_v40  ;;  %2198 = vmatprep.subr.bf16.mxu1 %v2792_v60 }
 0x250   :  { %2168 = vmatpush1.bf16.msra.mxu0 %v2775_v47  ;;  %2200 = vmatpush1.bf16.msra.mxu1 %v2798_v7 }
 0x251   :  { %2170 = vmatprep.subr.bf16.mxu0 %v2780_v52  ;;  %2202 = vmatprep.subr.bf16.mxu1 %v2804_v10 }
 0x254   :  { %2172 = vmatpush1.bf16.msra.mxu0 %v2790_v59  ;;  %2204 = vmatpush1.bf16.msra.mxu1 %v2810_v23 }
 0x255   :  { %2174 = vmatprep.subr.bf16.mxu0 %v2795_v0  ;;  %2206 = vmatprep.subr.bf16.mxu1 %v2816_v27 }
 0x258   :  { %2176 = vmatpush1.bf16.msra.mxu0 %v2802_v9  ;;  %2208 = vmatpush1.bf16.msra.mxu1 %v2822_v38 }
 0x259   :  { %2178 = vmatprep.subr.bf16.mxu0 %v2807_v15  ;;  %2210 = vmatprep.subr.bf16.mxu1 %v2828_v41 }
 0x25c   :  { %2180 = vmatpush1.bf16.msra.mxu0 %v2814_v26  ;;  %2212 = vmatpush1.bf16.msra.mxu1 %v2832_v49 }
 0x25d   :  { %2182 = vmatprep.subr.bf16.mxu0 %v2819_v31  ;;  %2214 = vmatprep.subr.bf16.mxu1 %v2836_v50 }
 0x260   :  { %2184 = vmatpush1.bf16.msra.mxu0 %v2826_v39  ;;  %2216 = vmatpush1.bf16.msra.mxu1 %v2841_v54 }
 0x261   :  { %2218 = vmatprep.subr.bf16.mxu0 %v2724_v8  ;;  %2250 = vmatprep.subr.bf16.mxu1 %v2750_v24 }
 0x316   :  { %v729_v17 = vpop.f32.mrb[4].mxu0  ;;  %v800_v5 = vpop.f32.mrb[12].mxu1 }
 0x317   :  { %v809_v11 = vrot.slane %v729_v17, 4  ;;  %v731_v14 = vpop.f32.mrb[5].mxu0  ;;  %v802_v18 = vpop.f32.mrb[13].mxu1  ;;  %v811_v44 = vrot.slane %v800_v5, 4  ;;  %v841_v17 = vrot.slane %v2946_v61, 6 }
 0x318   :  { %v810_v19 = vrot.slane %v731_v14, 4  ;;  %v812_v21 = vrot.slane %v802_v18, 4 }
 0x319   :  { %v817_v22 = vadd.f32 %v809_v11, %v2892_v34  ;;  %v819_v53 = vadd.f32 %v811_v44, %v2901_v62 }
 0x31a   :  { %v818_v28 = vadd.f32 %v810_v19, %v2894_v37  ;;  %v820_v43 = vadd.f32 %v812_v21, %v2898_v55 }
 0x31b   :  { %v1890_v30 = vmul.f32 -1.442695, %v817_v22 }
 0x31c   :  { %v1891_v42 = vmul.f32 -1.442695, %v818_v28  ;;  %v1892_v45 = vmul.f32 -1.442695, %v820_v43 }
 0x31d   :  { %2535 = vpow2.f32 %v1890_v30 }
 0x31e   :  { %2537 = vpow2.f32 %v1891_v42 }
 0x31f   :  { %2539 = vpow2.f32 %v1892_v45 }
 0x320   :  { %2541 = vtanh.f32 %v819_v53 }
 0x327   :  { %v2536_v56 = vpop.eup %2535 }
 0x328   :  { %v2538_v57 = vpop.eup %2537  ;;  %v824_v51 = vadd.f32 1.0, %v2536_v56 }
 0x329   :  { %v830_v63 = vadd.f32 1.0, %v2538_v57  ;;  %v2540_v2 = vpop.eup %2539 }
 0x32a   :  { %2543 = vrcp.f32 %v824_v51  ;;  %v2542_v3 = vpop.eup %2541  ;;  %v837_v18 = vadd.f32 1.0, %v2540_v2 }
 0x32b   :  { %2545 = vrcp.f32 %v830_v63 }
 0x32c   :  { %2547 = vrcp.f32 %v837_v18 }
 0x334   :  { %v2544_v4 = vpop.eup %2543 }
 0x335   :  { %v2546_v11 = vpop.eup %2545  ;;  %v844_v14 = vmul.f32 %v2544_v4, %v2542_v3 }
 0x336   :  { %v843_v5 = vmul.f32 %v2546_v11, %v841_v17  ;;  %v2548_v22 = vpop.eup %2547 }
 0x338   :  { %v2988_v19 = vadd.f32 %v844_v14, %v843_v5 }
 0x33a   :  { %2549 = vtanh.f32 %v2988_v19 }
 0x344   :  { %v2550_v28 = vpop.eup %2549 }
 0x345   :  { %v847_v30 = vmul.f32 %v2550_v28, %v2548_v22 }
 0x347   :  { %v849_v42 = vrot.slane %v847_v30, 4  ;;  %v1029_v30 = vrot.slane %v2988_v19, 6 }
 0x349   :  { %916 = vmatmul.mubr.f32.vlgmr.msra.gmra.mrb[6].mxu0 %v849_v42  ;;  %987 = vmatmul.mubr.f32.vlgmr.msra.gmra.mrb[14].mxu1 %v849_v42 }
 0x34a   :  { %2220 = vmatpush1.bf16.msra.mxu0 %v2732_v12  ;;  %2252 = vmatpush1.bf16.msra.mxu1 %v2758_v32 }
 0x34b   :  { %2222 = vmatprep.subr.bf16.mxu0 %v2739_v16  ;;  %2254 = vmatprep.subr.bf16.mxu1 %v2763_v36 }
 0x34c   :  { %1103 = vmatprep.mubr.f32.mxu0 %v2658_v1  ;;  %1174 = vmatprep.mubr.f32.mxu1 %v2658_v1 }
 0x34e   :  { %2224 = vmatpush1.bf16.msra.mxu0 %v2746_v20  ;;  %2256 = vmatpush1.bf16.msra.mxu1 %v2770_v46 }
 0x34f   :  { %2226 = vmatprep.subr.bf16.mxu0 %v2752_v25  ;;  %2258 = vmatprep.subr.bf16.mxu1 %v2777_v48 }
 0x352   :  { %2228 = vmatpush1.bf16.msra.mxu0 %v2761_v35  ;;  %2260 = vmatpush1.bf16.msra.mxu1 %v2785_v58 }
 0x353   :  { %2230 = vmatprep.subr.bf16.mxu0 %v2766_v40  ;;  %2262 = vmatprep.subr.bf16.mxu1 %v2792_v60 }
 0x356   :  { %2232 = vmatpush1.bf16.msra.mxu0 %v2775_v47  ;;  %2264 = vmatpush1.bf16.msra.mxu1 %v2798_v7 }
 0x357   :  { %2234 = vmatprep.subr.bf16.mxu0 %v2780_v52  ;;  %2266 = vmatprep.subr.bf16.mxu1 %v2804_v10 }
 0x35a   :  { %2236 = vmatpush1.bf16.msra.mxu0 %v2790_v59  ;;  %2268 = vmatpush1.bf16.msra.mxu1 %v2810_v23 }
 0x35b   :  { %2238 = vmatprep.subr.bf16.mxu0 %v2795_v0  ;;  %2270 = vmatprep.subr.bf16.mxu1 %v2816_v27 }
 0x35e   :  { %2240 = vmatpush1.bf16.msra.mxu0 %v2802_v9  ;;  %2272 = vmatpush1.bf16.msra.mxu1 %v2822_v38 }
 0x35f   :  { %2242 = vmatprep.subr.bf16.mxu0 %v2807_v15  ;;  %2274 = vmatprep.subr.bf16.mxu1 %v2828_v41 }
 0x362   :  { %2244 = vmatpush1.bf16.msra.mxu0 %v2814_v26  ;;  %2276 = vmatpush1.bf16.msra.mxu1 %v2832_v49 }
 0x363   :  { %2246 = vmatprep.subr.bf16.mxu0 %v2819_v31  ;;  %2278 = vmatprep.subr.bf16.mxu1 %v2836_v50 }
 0x366   :  { %2248 = vmatpush1.bf16.msra.mxu0 %v2826_v39  ;;  %2280 = vmatpush1.bf16.msra.mxu1 %v2841_v54 }
 0x367   :  { %2282 = vmatprep.subr.bf16.mxu0 %v2724_v8  ;;  %2314 = vmatprep.subr.bf16.mxu1 %v2750_v24 }
 0x41c   :  { %v917_v61 = vpop.f32.mrb[6].mxu0  ;;  %v988_v21 = vpop.f32.mrb[14].mxu1 }
 0x41d   :  { %v997_v43 = vrot.slane %v917_v61, 2  ;;  %v919_v44 = vpop.f32.mrb[7].mxu0  ;;  %v990_v45 = vpop.f32.mrb[15].mxu1  ;;  %v999_v4 = vrot.slane %v988_v21, 2 }
 0x41e   :  { %v998_v53 = vrot.slane %v919_v44, 2  ;;  %v1000_v2 = vrot.slane %v990_v45, 2 }
 0x41f   :  { %v1005_v56 = vadd.f32 %v997_v43, %v2892_v34  ;;  %v1007_v11 = vadd.f32 %v999_v4, %v2901_v62 }
 0x420   :  { %v1006_v57 = vadd.f32 %v998_v53, %v2894_v37  ;;  %v1008_v3 = vadd.f32 %v1000_v2, %v2898_v55 }
 0x421   :  { %v1893_v51 = vmul.f32 -1.442695, %v1005_v56 }
 0x422   :  { %v1894_v63 = vmul.f32 -1.442695, %v1006_v57  ;;  %v1895_v17 = vmul.f32 -1.442695, %v1008_v3 }
 0x423   :  { %2551 = vpow2.f32 %v1893_v51 }
 0x424   :  { %2553 = vpow2.f32 %v1894_v63 }
 0x425   :  { %2555 = vpow2.f32 %v1895_v17 }
 0x426   :  { %2557 = vtanh.f32 %v1007_v11 }
 0x42d   :  { %v2552_v14 = vpop.eup %2551 }
 0x42e   :  { %v2554_v18 = vpop.eup %2553  ;;  %v1012_v5 = vadd.f32 1.0, %v2552_v14 }
 0x42f   :  { %v1018_v22 = vadd.f32 1.0, %v2554_v18  ;;  %v2556_v34 = vpop.eup %2555 }
 0x430   :  { %2559 = vrcp.f32 %v1012_v5  ;;  %v2558_v37 = vpop.eup %2557  ;;  %v1025_v55 = vadd.f32 1.0, %v2556_v34 }
 0x431   :  { %2561 = vrcp.f32 %v1018_v22 }
 0x432   :  { %2563 = vrcp.f32 %v1025_v55 }
 0x43a   :  { %v2560_v28 = vpop.eup %2559 }
 0x43b   :  { %v2562_v42 = vpop.eup %2561  ;;  %v1032_v61 = vmul.f32 %v2560_v28, %v2558_v37 }
 0x43c   :  { %v1031_v21 = vmul.f32 %v2562_v42, %v1029_v30  ;;  %v2564_v62 = vpop.eup %2563 }
 0x43e   :  { %v3030_v43 = vadd.f32 %v1032_v61, %v1031_v21 }
 0x440   :  { %2565 = vtanh.f32 %v3030_v43  ;;  %v1205_v42 = vrot.slane %v3030_v43, 6 }
 0x44a   :  { %v2566_v44 = vpop.eup %2565 }
 0x44b   :  { %v1035_v45 = vmul.f32 %v2566_v44, %v2564_v62 }
 0x44d   :  { %v1037_v53 = vrot.slane %v1035_v45, 6 }
 0x44f   :  { %1104 = vmatmul.mubr.f32.vlgmr.msra.gmra.mrb[8].mxu0 %v1037_v53  ;;  %1175 = vmatmul.mubr.f32.vlgmr.msra.gmra.mrb[16].mxu1 %v1037_v53 }
 0x450   :  { %2284 = vmatpush1.bf16.msra.mxu0 %v2732_v12  ;;  %2316 = vmatpush1.bf16.msra.mxu1 %v2758_v32 }
 0x451   :  { %2286 = vmatprep.subr.bf16.mxu0 %v2739_v16  ;;  %2318 = vmatprep.subr.bf16.mxu1 %v2763_v36 }
 0x452   :  { %1276 = vmatprep.mubr.f32.mxu0 %v2658_v1  ;;  %1347 = vmatprep.mubr.f32.mxu1 %v2658_v1 }
 0x454   :  { %2288 = vmatpush1.bf16.msra.mxu0 %v2746_v20  ;;  %2320 = vmatpush1.bf16.msra.mxu1 %v2770_v46 }
 0x455   :  { %2290 = vmatprep.subr.bf16.mxu0 %v2752_v25  ;;  %2322 = vmatprep.subr.bf16.mxu1 %v2777_v48 }
 0x458   :  { %2292 = vmatpush1.bf16.msra.mxu0 %v2761_v35  ;;  %2324 = vmatpush1.bf16.msra.mxu1 %v2785_v58 }
 0x459   :  { %2294 = vmatprep.subr.bf16.mxu0 %v2766_v40  ;;  %2326 = vmatprep.subr.bf16.mxu1 %v2792_v60 }
 0x45c   :  { %2296 = vmatpush1.bf16.msra.mxu0 %v2775_v47  ;;  %2328 = vmatpush1.bf16.msra.mxu1 %v2798_v7 }
 0x45d   :  { %2298 = vmatprep.subr.bf16.mxu0 %v2780_v52  ;;  %2330 = vmatprep.subr.bf16.mxu1 %v2804_v10 }
 0x460   :  { %2300 = vmatpush1.bf16.msra.mxu0 %v2790_v59  ;;  %2332 = vmatpush1.bf16.msra.mxu1 %v2810_v23 }
 0x461   :  { %2302 = vmatprep.subr.bf16.mxu0 %v2795_v0  ;;  %2334 = vmatprep.subr.bf16.mxu1 %v2816_v27 }
 0x464   :  { %2304 = vmatpush1.bf16.msra.mxu0 %v2802_v9  ;;  %2336 = vmatpush1.bf16.msra.mxu1 %v2822_v38 }
 0x465   :  { %2306 = vmatprep.subr.bf16.mxu0 %v2807_v15  ;;  %2338 = vmatprep.subr.bf16.mxu1 %v2828_v41 }
 0x468   :  { %2308 = vmatpush1.bf16.msra.mxu0 %v2814_v26  ;;  %2340 = vmatpush1.bf16.msra.mxu1 %v2832_v49 }
 0x469   :  { %2310 = vmatprep.subr.bf16.mxu0 %v2819_v31  ;;  %2342 = vmatprep.subr.bf16.mxu1 %v2836_v50 }
 0x46c   :  { %2312 = vmatpush1.bf16.msra.mxu0 %v2826_v39  ;;  %2344 = vmatpush1.bf16.msra.mxu1 %v2841_v54 }
 0x46d   :  { %2346 = vmatprep.subr.bf16.mxu0 %v2724_v8  ;;  %2378 = vmatprep.subr.bf16.mxu1 %v2750_v24 }
 0x522   :  { %v1105_v19 = vpop.f32.mrb[8].mxu0  ;;  %v1176_v56 = vpop.f32.mrb[16].mxu1 }
 0x523   :  { %v1181_v57 = vadd.f32 %v1105_v19, %v2884_v6  ;;  %v1107_v51 = vpop.f32.mrb[9].mxu0  ;;  %v1178_v63 = vpop.f32.mrb[17].mxu1  ;;  %v1183_v14 = vadd.f32 %v1176_v56, %v2888_v29 }
 0x524   :  { %v1182_v2 = vadd.f32 %v1107_v51, %v2886_v13  ;;  %v1184_v17 = vadd.f32 %v1178_v63, %v2890_v33 }
 0x525   :  { %v1896_v3 = vmul.f32 -1.442695, %v1181_v57 }
 0x526   :  { %v1897_v4 = vmul.f32 -1.442695, %v1182_v2  ;;  %v1898_v11 = vmul.f32 -1.442695, %v1184_v17 }
 0x527   :  { %2567 = vpow2.f32 %v1896_v3 }
 0x528   :  { %2569 = vpow2.f32 %v1897_v4 }
 0x529   :  { %2571 = vpow2.f32 %v1898_v11 }
 0x52a   :  { %2573 = vtanh.f32 %v1183_v14 }
 0x531   :  { %v2568_v18 = vpop.eup %2567 }
 0x532   :  { %v2570_v5 = vpop.eup %2569  ;;  %v1188_v22 = vadd.f32 1.0, %v2568_v18 }
 0x533   :  { %v1194_v34 = vadd.f32 1.0, %v2570_v5  ;;  %v2572_v37 = vpop.eup %2571 }
 0x534   :  { %2575 = vrcp.f32 %v1188_v22  ;;  %v2574_v28 = vpop.eup %2573  ;;  %v1201_v21 = vadd.f32 1.0, %v2572_v37 }
 0x535   :  { %2577 = vrcp.f32 %v1194_v34 }
 0x536   :  { %2579 = vrcp.f32 %v1201_v21 }
 0x53e   :  { %v2576_v30 = vpop.eup %2575 }
 0x53f   :  { %v2578_v61 = vpop.eup %2577  ;;  %v1208_v55 = vmul.f32 %v2576_v30, %v2574_v28 }
 0x540   :  { %v1207_v62 = vmul.f32 %v2578_v61, %v1205_v42  ;;  %v2580_v45 = vpop.eup %2579 }
 0x542   :  { %v3072_v44 = vadd.f32 %v1208_v55, %v1207_v62 }
 0x544   :  { %2581 = vtanh.f32 %v3072_v44  ;;  %v1390_v55 = vrot.slane %v3072_v44, 6 }
 0x54e   :  { %v2582_v53 = vpop.eup %2581 }
 0x54f   :  { %v1211_v19 = vmul.f32 %v2582_v53, %v2580_v45 }
 0x551   :  { %1277 = vmatmul.mubr.f32.vlgmr.msra.gmra.mrb[10].mxu0 %v1211_v19  ;;  %1348 = vmatmul.mubr.f32.vlgmr.msra.gmra.mrb[18].mxu1 %v1211_v19 }
 0x552   :  { %2348 = vmatpush1.bf16.msra.mxu0 %v2732_v12  ;;  %2380 = vmatpush1.bf16.msra.mxu1 %v2758_v32 }
 0x553   :  { %2350 = vmatprep.subr.bf16.mxu0 %v2739_v16  ;;  %2382 = vmatprep.subr.bf16.mxu1 %v2763_v36 }
 0x554   :  { %1464 = vmatprep.mubr.f32.mxu0 %v2658_v1  ;;  %1535 = vmatprep.mubr.f32.mxu1 %v2658_v1 }
 0x556   :  { %2352 = vmatpush1.bf16.msra.mxu0 %v2746_v20  ;;  %2384 = vmatpush1.bf16.msra.mxu1 %v2770_v46 }
 0x557   :  { %2354 = vmatprep.subr.bf16.mxu0 %v2752_v25  ;;  %2386 = vmatprep.subr.bf16.mxu1 %v2777_v48 }
 0x55a   :  { %2356 = vmatpush1.bf16.msra.mxu0 %v2761_v35  ;;  %2388 = vmatpush1.bf16.msra.mxu1 %v2785_v58 }
 0x55b   :  { %2358 = vmatprep.subr.bf16.mxu0 %v2766_v40  ;;  %2390 = vmatprep.subr.bf16.mxu1 %v2792_v60 }
 0x55e   :  { %2360 = vmatpush1.bf16.msra.mxu0 %v2775_v47  ;;  %2392 = vmatpush1.bf16.msra.mxu1 %v2798_v7 }
 0x55f   :  { %2362 = vmatprep.subr.bf16.mxu0 %v2780_v52  ;;  %2394 = vmatprep.subr.bf16.mxu1 %v2804_v10 }
 0x562   :  { %2364 = vmatpush1.bf16.msra.mxu0 %v2790_v59  ;;  %2396 = vmatpush1.bf16.msra.mxu1 %v2810_v23 }
 0x563   :  { %2366 = vmatprep.subr.bf16.mxu0 %v2795_v0  ;;  %2398 = vmatprep.subr.bf16.mxu1 %v2816_v27 }
 0x566   :  { %2368 = vmatpush1.bf16.msra.mxu0 %v2802_v9  ;;  %2400 = vmatpush1.bf16.msra.mxu1 %v2822_v38 }
 0x567   :  { %2370 = vmatprep.subr.bf16.mxu0 %v2807_v15  ;;  %2402 = vmatprep.subr.bf16.mxu1 %v2828_v41 }
 0x56a   :  { %2372 = vmatpush1.bf16.msra.mxu0 %v2814_v26  ;;  %2404 = vmatpush1.bf16.msra.mxu1 %v2832_v49 }
 0x56b   :  { %2374 = vmatprep.subr.bf16.mxu0 %v2819_v31  ;;  %2406 = vmatprep.subr.bf16.mxu1 %v2836_v50 }
 0x56e   :  { %2376 = vmatpush1.bf16.msra.mxu0 %v2826_v39  ;;  %2408 = vmatpush1.bf16.msra.mxu1 %v2841_v54 }
 0x56f   :  { %2410 = vmatprep.subr.bf16.mxu0 %v2724_v8  ;;  %2442 = vmatprep.subr.bf16.mxu1 %v2750_v24 }
 0x624   :  { %v1278_v43 = vpop.f32.mrb[10].mxu0  ;;  %v1349_v56 = vpop.f32.mrb[18].mxu1 }
 0x625   :  { %v1358_v57 = vrot.slane %v1278_v43, 6  ;;  %v1280_v51 = vpop.f32.mrb[11].mxu0  ;;  %v1351_v63 = vpop.f32.mrb[19].mxu1  ;;  %v1360_v8 = vrot.slane %v1349_v56, 6 }
 0x626   :  { %v1359_v2 = vrot.slane %v1280_v51, 6  ;;  %v1361_v14 = vrot.slane %v1351_v63, 6 }
 0x627   :  { %v1366_v3 = vadd.f32 %v1358_v57, %v2884_v6  ;;  %v1368_v24 = vadd.f32 %v1360_v8, %v2888_v29  ;;  %v1777_v8 = vld [vmem:[%s3218_s4 + $0x20] sm:$0xff] }
 0x628   :  { %v1367_v4 = vadd.f32 %v1359_v2, %v2886_v13  ;;  %v1369_v18 = vadd.f32 %v1361_v14, %v2890_v33  ;;  %v1773_v2 = vld [vmem:[%s3218_s4] sm:$0xff]  ;;  %v1776_v14 = vld [vmem:[%s3218_s4 + $0x18] sm:$0xff] }
 0x629   :  { %v1899_v17 = vmul.f32 -1.442695, %v1366_v3  ;;  %v1774_v3 = vld [vmem:[%s3218_s4 + $0x8] sm:$0xff] }
 0x62a   :  { %v1900_v11 = vmul.f32 -1.442695, %v1367_v4  ;;  %v1901_v5 = vmul.f32 -1.442695, %v1369_v18  ;;  %v2474_v4 = vpack.c.bf16 %v1774_v3, %v1773_v2 }
 0x62b   :  { %2583 = vpow2.f32 %v1899_v17  ;;  %v2659_v17 = vmov 0.0|0.0  }
 0x62c   :  { %2585 = vpow2.f32 %v1900_v11  ;;  %v1775_v11 = vld [vmem:[%s3218_s4 + $0x10] sm:$0xff] }
 0x62d   :  { %2587 = vpow2.f32 %v1901_v5  ;;  %v2477_v18 = vpack.c.bf16 %v1776_v14, %v1775_v11  ;;  %v1778_v5 = vld [vmem:[%s3218_s4 + $0x28] sm:$0xff] }
 0x62e   :  { %2589 = vtanh.f32 %v1368_v24  ;;  %v2480_v24 = vpack.c.bf16 %v1778_v5, %v1777_v8 }
 0x635   :  { %v2584_v22 = vpop.eup %2583 }
 0x636   :  { %v2586_v34 = vpop.eup %2585  ;;  %v1373_v37 = vadd.f32 1.0, %v2584_v22  ;;  %v1779_v22 = vld [vmem:[%s3218_s4 + $0x30] sm:$0xff] }
 0x637   :  { %v1379_v28 = vadd.f32 1.0, %v2586_v34  ;;  %v2588_v30 = vpop.eup %2587  ;;  %v1780_v34 = vld [vmem:[%s3218_s4 + $0x38] sm:$0xff] }
 0x638   :  { %2591 = vrcp.f32 %v1373_v37  ;;  %v2590_v42 = vpop.eup %2589  ;;  %v1386_v45 = vadd.f32 1.0, %v2588_v30  ;;  %v2483_v37 = vpack.c.bf16 %v1780_v34, %v1779_v22  ;;  %v1782_v30 = vld [vmem:[%s3218_s4 + $0x48] sm:$0xff] }
 0x639   :  { %2593 = vrcp.f32 %v1379_v28  ;;  %v1781_v28 = vld [vmem:[%s3218_s4 + $0x40] sm:$0xff] }
 0x63a   :  { %2595 = vrcp.f32 %v1386_v45 }
 0x642   :  { %v2592_v61 = vpop.eup %2591 }
 0x643   :  { %v2594_v21 = vpop.eup %2593  ;;  %v1393_v62 = vmul.f32 %v2592_v61, %v2590_v42  ;;  %v2486_v42 = vpack.c.bf16 %v1782_v30, %v1781_v28  ;;  %v1783_v61 = vld [vmem:[%s3218_s4 + $0x50] sm:$0xff] }
 0x644   :  { %v1392_v53 = vmul.f32 %v2594_v21, %v1390_v55  ;;  %v2596_v43 = vpop.eup %2595  ;;  %v1784_v55 = vld [vmem:[%s3218_s4 + $0x58] sm:$0xff] }
 0x645   :  { %v2489_v21 = vpack.c.bf16 %v1784_v55, %v1783_v61 }
 0x646   :  { %v3114_v19 = vadd.f32 %v1393_v62, %v1392_v53  ;;  %v1785_v62 = vld [vmem:[%s3218_s4 + $0x60] sm:$0xff]  ;;  %v1787_v53 = vld [vmem:[%s3218_s4 + $0x70] sm:$0xff] }
 0x648   :  { %2597 = vtanh.f32 %v3114_v19 }
 0x652   :  { %v2598_v56 = vpop.eup %2597 }
 0x653   :  { %v1396_v57 = vmul.f32 %v2598_v56, %v2596_v43 }
 0x655   :  { %v1398_v51 = vrot.slane %v1396_v57, 2 }
 0x657   :  { %1465 = vmatmul.mubr.f32.vlgmr.msra.gmra.mrb[12].mxu0 %v1398_v51  ;;  %1536 = vmatmul.mubr.f32.vlgmr.msra.gmra.mrb[20].mxu1 %v1398_v51 }
 0x658   :  { %2412 = vmatpush1.bf16.msra.mxu0 %v2732_v12  ;;  %2444 = vmatpush1.bf16.msra.mxu1 %v2758_v32 }
 0x659   :  { %2414 = vmatprep.subr.bf16.mxu0 %v2739_v16  ;;  %2446 = vmatprep.subr.bf16.mxu1 %v2763_v36 }
 0x65a   :  { %1652 = vmatprep.mubr.f32.mxu0 %v2658_v1  ;;  %1723 = vmatprep.mubr.f32.mxu1 %v2658_v1 }
 0x65c   :  { %2416 = vmatpush1.bf16.msra.mxu0 %v2746_v20  ;;  %2448 = vmatpush1.bf16.msra.mxu1 %v2770_v46 }
 0x65d   :  { %2418 = vmatprep.subr.bf16.mxu0 %v2752_v25  ;;  %2450 = vmatprep.subr.bf16.mxu1 %v2777_v48 }
 0x660   :  { %2420 = vmatpush1.bf16.msra.mxu0 %v2761_v35  ;;  %2452 = vmatpush1.bf16.msra.mxu1 %v2785_v58 }
 0x661   :  { %2422 = vmatprep.subr.bf16.mxu0 %v2766_v40  ;;  %2454 = vmatprep.subr.bf16.mxu1 %v2792_v60 }
 0x664   :  { %2424 = vmatpush1.bf16.msra.mxu0 %v2775_v47  ;;  %2456 = vmatpush1.bf16.msra.mxu1 %v2798_v7 }
 0x665   :  { %2426 = vmatprep.subr.bf16.mxu0 %v2780_v52  ;;  %2458 = vmatprep.subr.bf16.mxu1 %v2804_v10 }
 0x668   :  { %2428 = vmatpush1.bf16.msra.mxu0 %v2790_v59  ;;  %2460 = vmatpush1.bf16.msra.mxu1 %v2810_v23 }
 0x669   :  { %2430 = vmatprep.subr.bf16.mxu0 %v2795_v0  ;;  %2462 = vmatprep.subr.bf16.mxu1 %v2816_v27  ;;  %v1578_v27 = vrot.slane %v3114_v19, 6  ;;  %v1788_v19 = vld [vmem:[%s3218_s4 + $0x78] sm:$0xff] }
 0x66a   :  { %v2495_v43 = vpack.c.bf16 %v1788_v19, %v1787_v53 }
 0x66c   :  { %2432 = vmatpush1.bf16.msra.mxu0 %v2802_v9  ;;  %2464 = vmatpush1.bf16.msra.mxu1 %v2822_v38 }
 0x66d   :  { %2434 = vmatprep.subr.bf16.mxu0 %v2807_v15  ;;  %2466 = vmatprep.subr.bf16.mxu1 %v2828_v41 }
 0x670   :  { %2436 = vmatpush1.bf16.msra.mxu0 %v2814_v26  ;;  %2468 = vmatpush1.bf16.msra.mxu1 %v2832_v49 }
 0x671   :  { %2438 = vmatprep.subr.bf16.mxu0 %v2819_v31  ;;  %2470 = vmatprep.subr.bf16.mxu1 %v2836_v50 }
 0x674   :  { %2440 = vmatpush1.bf16.msra.mxu0 %v2826_v39  ;;  %2472 = vmatpush1.bf16.msra.mxu1 %v2841_v54 }
 0x675   :  { %2473 = vmatprep.subr.bf16.mxu0 %v2659_v17 }
 0x72a   :  { %v1466_v12 = vpop.f32.mrb[12].mxu0  ;;  %v1537_v16 = vpop.f32.mrb[20].mxu1 }
 0x72b   :  { %v1546_v20 = vrot.slane %v1466_v12, 4  ;;  %v1468_v25 = vpop.f32.mrb[13].mxu0  ;;  %v1539_v32 = vpop.f32.mrb[21].mxu1  ;;  %v1548_v58 = vrot.slane %v1537_v16, 4 }
 0x72c   :  { %v1547_v35 = vrot.slane %v1468_v25, 4  ;;  %v1549_v48 = vrot.slane %v1539_v32, 4 }
 0x72d   :  { %v1554_v36 = vadd.f32 %v1546_v20, %v2884_v6  ;;  %v1556_v60 = vadd.f32 %v1548_v58, %v2888_v29 }
 0x72e   :  { %v1555_v40 = vadd.f32 %v1547_v35, %v2886_v13  ;;  %v1557_v52 = vadd.f32 %v1549_v48, %v2890_v33 }
 0x72f   :  { %v1902_v46 = vmul.f32 -1.442695, %v1554_v36 }
 0x730   :  { %v1903_v47 = vmul.f32 -1.442695, %v1555_v40  ;;  %v1904_v59 = vmul.f32 -1.442695, %v1557_v52 }
 0x731   :  { %2599 = vpow2.f32 %v1902_v46 }
 0x732   :  { %2601 = vpow2.f32 %v1903_v47 }
 0x733   :  { %2603 = vpow2.f32 %v1904_v59 }
 0x734   :  { %2605 = vtanh.f32 %v1556_v60 }
 0x73b   :  { %v2600_v0 = vpop.eup %2599 }
 0x73c   :  { %v2602_v7 = vpop.eup %2601  ;;  %v1561_v9 = vadd.f32 1.0, %v2600_v0 }
 0x73d   :  { %v1567_v10 = vadd.f32 1.0, %v2602_v7  ;;  %v2604_v15 = vpop.eup %2603 }
 0x73e   :  { %2607 = vrcp.f32 %v1561_v9  ;;  %v2606_v23 = vpop.eup %2605  ;;  %v1574_v39 = vadd.f32 1.0, %v2604_v15 }
 0x73f   :  { %2609 = vrcp.f32 %v1567_v10 }
 0x740   :  { %2611 = vrcp.f32 %v1574_v39  ;;  %v1908_v39 = vld [vmem:[#allocation2] ss:$0 sm:$0xff] }
 0x748   :  { %v2608_v26 = vpop.eup %2607 }
 0x749   :  { %v2610_v31 = vpop.eup %2609  ;;  %v1581_v38 = vmul.f32 %v2608_v26, %v2606_v23 }
 0x74a   :  { %v1580_v41 = vmul.f32 %v2610_v31, %v1578_v27  ;;  %v2612_v50 = vpop.eup %2611 }
 0x74c   :  { %v3154_v49 = vadd.f32 %v1581_v38, %v1580_v41 }
 0x74e   :  { %2613 = vtanh.f32 %v3154_v49  ;;  %v1766_v9 = vrot.slane %v3154_v49, 6 }
 0x758   :  { %v2614_v54 = vpop.eup %2613 }
 0x759   :  { %v1584_v44 = vmul.f32 %v2614_v54, %v2612_v50 }
 0x75b   :  { %v1586_v63 = vrot.slane %v1584_v44, 4 }
 0x75d   :  { %1653 = vmatmul.mubr.f32.vlgmr.msra.gmra.mrb[14].mxu0 %v1586_v63  ;;  %1724 = vmatmul.mubr.f32.vlgmr.msra.gmra.mrb[22].mxu1 %v1586_v63 }
 0x75e   :  { %2475 = vmatpush3.bf16.msra.mxu0 %v2474_v4  ;;  %1958 = vmatprep.mubr.msk.f32.mxu0 %vm2660_vm2, %v2658_v1  ;;  %v1786_v1 = vld [vmem:[%s3218_s4 + $0x68] sm:$0xff] }
 0x75f   :  { %2476 = vmatprep.subr.bf16.mxu0 %v2659_v17  ;;  %v2492_v45 = vpack.c.bf16 %v1786_v1, %v1785_v62 }
 0x762   :  { %2478 = vmatpush3.bf16.msra.mxu0 %v2477_v18 }
 0x763   :  { %2479 = vmatprep.subr.bf16.mxu0 %v2659_v17 }
 0x766   :  { %2481 = vmatpush3.bf16.msra.mxu0 %v2480_v24 }
 0x767   :  { %2482 = vmatprep.subr.bf16.mxu0 %v2659_v17 }
 0x76a   :  { %2484 = vmatpush3.bf16.msra.mxu0 %v2483_v37 }
 0x76b   :  { %2485 = vmatprep.subr.bf16.mxu0 %v2659_v17 }
 0x76e   :  { %2487 = vmatpush3.bf16.msra.mxu0 %v2486_v42 }
 0x76f   :  { %2488 = vmatprep.subr.bf16.mxu0 %v2659_v17 }
 0x772   :  { %2490 = vmatpush3.bf16.msra.mxu0 %v2489_v21 }
 0x773   :  { %2491 = vmatprep.subr.bf16.mxu0 %v2659_v17 }
 0x776   :  { %2493 = vmatpush3.bf16.msra.mxu0 %v2492_v45 }
 0x777   :  { %2494 = vmatprep.subr.bf16.mxu0 %v2659_v17 }
 0x77a   :  { %2496 = vmatpush3.bf16.msra.mxu0 %v2495_v43 }
 0x830   :  { %v1654_v56 = vpop.f32.mrb[14].mxu0  ;;  %v1725_v57 = vpop.f32.mrb[22].mxu1 }
 0x831   :  { %v1734_v51 = vrot.slane %v1654_v56, 2  ;;  %v1656_v12 = vpop.f32.mrb[15].mxu0  ;;  %v1727_v16 = vpop.f32.mrb[23].mxu1  ;;  %v1736_v47 = vrot.slane %v1725_v57, 2 }
 0x832   :  { %v1735_v20 = vrot.slane %v1656_v12, 2  ;;  %v1737_v40 = vrot.slane %v1727_v16, 2 }
 0x833   :  { %v1742_v25 = vadd.f32 %v1734_v51, %v2884_v6  ;;  %v1744_v52 = vadd.f32 %v1736_v47, %v2888_v29 }
 0x834   :  { %v1743_v32 = vadd.f32 %v1735_v20, %v2886_v13  ;;  %v1745_v46 = vadd.f32 %v1737_v40, %v2890_v33 }
 0x835   :  { %v1905_v35 = vmul.f32 -1.442695, %v1742_v25 }
 0x836   :  { %v1906_v36 = vmul.f32 -1.442695, %v1743_v32  ;;  %v1907_v48 = vmul.f32 -1.442695, %v1745_v46 }
 0x837   :  { %2615 = vpow2.f32 %v1905_v35 }
 0x838   :  { %2617 = vpow2.f32 %v1906_v36 }
 0x839   :  { %2619 = vpow2.f32 %v1907_v48 }
 0x83a   :  { %2621 = vtanh.f32 %v1744_v52 }
 0x841   :  { %v2616_v58 = vpop.eup %2615 }
 0x842   :  { %v2618_v59 = vpop.eup %2617  ;;  %v1749_v60 = vadd.f32 1.0, %v2616_v58 }
 0x843   :  { %v1755_v0 = vadd.f32 1.0, %v2618_v59  ;;  %v2620_v6 = vpop.eup %2619 }
 0x844   :  { %2623 = vrcp.f32 %v1749_v60  ;;  %v2622_v13 = vpop.eup %2621  ;;  %v1762_v33 = vadd.f32 1.0, %v2620_v6 }
 0x845   :  { %2625 = vrcp.f32 %v1755_v0 }
 0x846   :  { %2627 = vrcp.f32 %v1762_v33 }
 0x84e   :  { %v2624_v7 = vpop.eup %2623 }
 0x84f   :  { %v2626_v10 = vpop.eup %2625  ;;  %v1769_v15 = vmul.f32 %v2624_v7, %v2622_v13 }
 0x850   :  { %v1768_v23 = vmul.f32 %v2626_v10, %v1766_v9  ;;  %v2628_v29 = vpop.eup %2627 }
 0x852   :  { %v1770_v26 = vadd.f32 %v1769_v15, %v1768_v23 }
 0x854   :  { %2629 = vtanh.f32 %v1770_v26 }
 0x85e   :  { %v2630_v27 = vpop.eup %2629 }
 0x85f   :  { %v1772_v31 = vmul.f32 %v2630_v27, %v2628_v29 }
 0x861   :  { %v1797_v38 = vrot.slane %v1772_v31, 6 }
 0x863   :  { %1959 = vmatmul.mubr.f32.vlgmr.msra.gmra.mrb[16].mxu0 %v1797_v38 }
 0x936   :  { %v1865_v41 = vpop.f32.mrb[16].mxu0 }
 0x937   :  { %v1866_v50 = vadd.f32 %v1908_v39, %v1865_v41  ;;  %v1960_v54 = vpop.f32.mrb[17].mxu0 }
 0x939   :  { %1870 = vst.msk [vmem:[%s3220_s6] sm:$0x3] %vm1869_vm3, %v1866_v50 }
 0x93a   :  { %1875 = vsyncpa [#allocation4], 1 }

</bundles_post_ra>
